<compile_context>
chip_gen: v7x
topology: tpu7x:2x2x1
jax: 0.10.0
libtpu: 0.0.40
codegen_flags: <defaults>
</compile_context>

<pallas_src>
import math
from functools import partial

import jax
import jax.numpy as jnp
from jax import lax
from jax.experimental import pallas as pl
from jax.experimental.pallas import tpu as pltpu

# ---- module dimensions (fixed by PolarOut defaults) -------------------------
NODE_DIM = 128            # node_dim
EDGE_0E = 128             # 128x0e
EDGE_1O = 64 * 3          # 64x1o  (dropped by o3.Linear -> hidden has no 1o)
EDGE_2E_MUL = 32          # 32x2e
L2_DIM = 5                # 2l+1 for l=2
EDGE_DIM = EDGE_0E + EDGE_1O + EDGE_2E_MUL * L2_DIM      # 480
HIDDEN_DIM = 64           # scalar MLP hidden
HID_0E = 64               # hidden_irreps 64x0e
HID_2E_MUL = 16           # hidden_irreps 16x2e
SPH_HID = HID_0E + L2_DIM * HID_2E_MUL                   # 144, 2e col = 64 + 16*m + k
OUT_W = 128               # lane-padded width of stage-2 / scatter outputs
EPS2 = 1e-12              # numerical floor inside sqrt for the 2e gate norm


def _polar_kernel(n_valid, n_mol_p,
                  batch_ref, xs_ref, xsph_ref,
                  wm1_ref, bm1_ref, wsph1_ref, bsph1_ref,
                  fold_ref, expand_ref,
                  wm2_ref, bscal_ref, wsph2_ref, bsph2_ref,
                  out_ref):
    """One node tile -> one (n_mol_p, 128) partial molecule sum (lane-dense store)."""
    f32, bf16 = jnp.float32, jnp.bfloat16
    t = pl.program_id(0)
    tn = xs_ref.shape[0]

    xs = xs_ref[...].astype(bf16)                    # (tn, 128)
    xsph = xsph_ref[...].astype(bf16)                # (tn, 480)

    # ---- stage 1: scalar MLP lin1 and o3.Linear(edge_irreps -> hidden_irreps)
    # wsph1 has zero rows for the 64x1o block and the (mul,m)->(m,mul) layout
    # permutation folded in, so the 480-wide input is consumed unsliced.
    h = jnp.dot(xs, wm1_ref[...], preferred_element_type=f32) + bm1_ref[...]        # (tn, 64)
    hs = jnp.dot(xsph, wsph1_ref[...], preferred_element_type=f32) + bsph1_ref[...]  # (tn, 144)

    # scalar MLP activation (SiLU) on VPU/EUP in f32
    h_act = h * jax.nn.sigmoid(h)

    # ---- Gate(hidden_irreps): x * sigmoid(||x||) per irrep (full-width, no slicing)
    # TODO(synk): xequinet's Gate/Invariant eps convention not reproduced bit-for-bit;
    # implemented as norm-gated sigmoid (|x| for each 0e channel).
    n2 = jnp.dot(hs * hs, fold_ref[...], preferred_element_type=f32)     # (tn, 16) per-k sum_m h2^2
    g2 = jax.nn.sigmoid(jnp.sqrt(n2 + EPS2))                             # (tn, 16)
    gate2 = jnp.dot(g2, expand_ref[...], preferred_element_type=f32)     # (tn, 144), zero on 0e lanes
    lane = lax.broadcasted_iota(jnp.int32, hs.shape, 1)
    gate = jnp.where(lane < HID_0E, jax.nn.sigmoid(jnp.abs(hs)), gate2)  # one EUP pass + select
    z = (hs * gate).astype(bf16)                                         # (tn, 144)

    # ---- stage 2 (output columns lane-padded to 128 by zero weight columns)
    # bscal = [scal0, scal1 x5, 0...],  psph = [s0, s2_m0..m4, 0...]
    bscal = jnp.dot(h_act.astype(bf16), wm2_ref[...],
                    preferred_element_type=f32) + bscal_ref[...]          # (tn, 128)
    psph = jnp.dot(z, wsph2_ref[...],
                   preferred_element_type=f32) + bsph2_ref[...]           # (tn, 128)
    # rsh_conv: ElementwiseTensorProduct('1x0e + 1x2e', '2x0e')
    atom = psph * bscal                                                   # (tn, 128); cols >= 6 are 0

    # ---- tail mask for the ragged last tile (also kills NaN/Inf garbage rows)
    node_idx = t * tn + lax.broadcasted_iota(jnp.int32, (tn, 1), 0)
    atom = jnp.where(node_idx < n_valid, atom, 0.0)

    # ---- per-molecule partial scatter-sum: one one-hot matmul, lane-dense output.
    # Kept in f32 so the per-molecule sums are not re-quantized (MXU cost is tiny
    # vs the per-tile HBM time).
    # TODO(synk): for very large n_mol, window the molecule axis (batch is sorted)
    # or fall back to per-node output + XLA segment_sum.
    bids = batch_ref[...]                                                 # (1, tn) int32
    mol_iota = lax.broadcasted_iota(jnp.int32, (n_mol_p, tn), 0)
    onehot = (mol_iota == bids).astype(f32)                               # (n_mol_p, tn)
    out_ref[...] = jnp.dot(onehot, atom, preferred_element_type=f32)[None]


def init_params(key, zero_biases=True):
    """Synthetic deterministic parameters (shapes from PolarOut.__init__).

    o3.Linear biases exist only for the scalar (0e) outputs.  PolarOut.__init__
    zero-inits every bias; pass zero_biases=False to exercise the bias path
    (as a trained checkpoint would)."""
    f32 = jnp.float32
    ks = jax.random.split(key, 10)
    p = dict(
        wm1=jax.random.normal(ks[0], (NODE_DIM, HIDDEN_DIM), f32) / math.sqrt(NODE_DIM),
        wm2=jax.random.normal(ks[1], (HIDDEN_DIM, 2), f32) / math.sqrt(HIDDEN_DIM),
        w0a=jax.random.normal(ks[2], (EDGE_0E, HID_0E), f32) / math.sqrt(EDGE_0E),
        w2a=jax.random.normal(ks[3], (EDGE_2E_MUL, HID_2E_MUL), f32) / math.sqrt(EDGE_2E_MUL),
        w0b=jax.random.normal(ks[4], (HID_0E, 1), f32) / math.sqrt(HID_0E),
        w2b=jax.random.normal(ks[5], (HID_2E_MUL, 1), f32) / math.sqrt(HID_2E_MUL),
    )
    if zero_biases:
        p.update(bm1=jnp.zeros((HIDDEN_DIM,), f32), bm2=jnp.zeros((2,), f32),
                 b0a=jnp.zeros((HID_0E,), f32), b0b=jnp.zeros((1,), f32))
    else:
        p.update(bm1=0.1 * jax.random.normal(ks[6], (HIDDEN_DIM,), f32),
                 bm2=0.1 * jax.random.normal(ks[7], (2,), f32),
                 b0a=0.1 * jax.random.normal(ks[8], (HID_0E,), f32),
                 b0b=0.1 * jax.random.normal(ks[9], (1,), f32))
    return p


def polar_out_forward(x_scalar, x_spherical, batch, params, n_mol,
                      *, output_dim=9, tile_n=2048):
    f32, bf16 = jnp.float32, jnp.bfloat16
    N = x_scalar.shape[0]
    assert tile_n % 128 == 0, "tile_n must be a multiple of 128"
    n_tiles = pl.cdiv(N, tile_n)
    n_mol_p = ((n_mol + 127) // 128) * 128           # lane-dense partial output rows

    p = params
    # ---- stage-1 weights -----------------------------------------------------
    wm1 = p["wm1"].astype(bf16)                                            # (128, 64)
    bm1 = p["bm1"].reshape(1, HIDDEN_DIM)

    # o3.Linear(edge -> hidden): zero rows drop the 64x1o block; the 2e (mul,m)
    # -> (m,mul) layout permutation is baked into the weight.
    w_sph1 = jnp.zeros((EDGE_DIM, SPH_HID), f32)
    w_sph1 = w_sph1.at[:EDGE_0E, :HID_0E].set(p["w0a"])
    blk = jnp.einsum("ik,mp->impk", p["w2a"], jnp.eye(L2_DIM, dtype=f32))
    blk = blk.reshape(EDGE_2E_MUL * L2_DIM, L2_DIM * HID_2E_MUL)           # (160, 80)
    w_sph1 = w_sph1.at[EDGE_0E + EDGE_1O:, HID_0E:].set(blk).astype(bf16)  # (480, 144)
    b_sph1 = jnp.concatenate(
        [p["b0a"], jnp.zeros((SPH_HID - HID_0E,), f32)]).reshape(1, SPH_HID)

    # ---- Gate fold / expand (per-k 2e squared norms) ---------------------------
    eye16 = jnp.eye(HID_2E_MUL, dtype=f32)
    fold = jnp.concatenate([jnp.zeros((HID_0E, HID_2E_MUL), f32),
                            jnp.tile(eye16, (L2_DIM, 1))], axis=0)         # (144, 16)
    expand = jnp.concatenate([jnp.zeros((HID_2E_MUL, HID_0E), f32),
                              jnp.tile(eye16, (1, L2_DIM))], axis=1)       # (16, 144)

    # ---- stage-2 weights, lane-padded to OUT_W columns -------------------------
    sel = jnp.zeros((2, OUT_W), f32).at[0, 0].set(1.0).at[1, 1:6].set(1.0)
    wm2_sel = (p["wm2"] @ sel).astype(bf16)                                # (64, 128)
    b_scal = p["bm2"].reshape(1, 2) @ sel                                  # (1, 128)
    w_sph2 = jnp.zeros((SPH_HID, OUT_W), f32)
    w_sph2 = w_sph2.at[:HID_0E, 0].set(p["w0b"][:, 0])
    for m in range(L2_DIM):
        w_sph2 = w_sph2.at[HID_0E + HID_2E_MUL * m:HID_0E + HID_2E_MUL * (m + 1),
                           1 + m].set(p["w2b"][:, 0])
    w_sph2 = w_sph2.astype(bf16)                                           # (144, 128)
    b_sph2 = jnp.zeros((1, OUT_W), f32).at[0, 0].set(p["b0b"][0])

    batch_row = batch.reshape(1, N).astype(jnp.int32)

    def const_spec(shape):
        return pl.BlockSpec(shape, lambda t: (0,) * len(shape))

    cost = pl.CostEstimate(
        flops=int(2 * N * (NODE_DIM * HIDDEN_DIM + EDGE_DIM * SPH_HID
                           + 2 * SPH_HID * HID_2E_MUL
                           + (HIDDEN_DIM + SPH_HID) * OUT_W + n_mol_p * OUT_W)),
        transcendentals=int(N * (HIDDEN_DIM + SPH_HID + 2 * HID_2E_MUL)),
        bytes_accessed=int(N * (NODE_DIM + EDGE_DIM + 1) * 4
                           + n_tiles * n_mol_p * OUT_W * 4),
    )

    partials = pl.pallas_call(
        partial(_polar_kernel, N, n_mol_p),
        out_shape=jax.ShapeDtypeStruct((n_tiles, n_mol_p, OUT_W), f32),
        grid_spec=pltpu.PrefetchScalarGridSpec(
            num_scalar_prefetch=0,
            grid=(n_tiles,),
            in_specs=[
                pl.BlockSpec((1, tile_n), lambda t: (0, t)),               # batch ids
                pl.BlockSpec((tile_n, NODE_DIM), lambda t: (t, 0)),        # x_scalar (f32)
                pl.BlockSpec((tile_n, EDGE_DIM), lambda t: (t, 0)),        # x_spherical (f32)
                const_spec((NODE_DIM, HIDDEN_DIM)),                        # wm1
                const_spec((1, HIDDEN_DIM)),                               # bm1
                const_spec((EDGE_DIM, SPH_HID)),                           # w_sph1
                const_spec((1, SPH_HID)),                                  # b_sph1
                const_spec((SPH_HID, HID_2E_MUL)),                         # fold
                const_spec((HID_2E_MUL, SPH_HID)),                         # expand
                const_spec((HIDDEN_DIM, OUT_W)),                           # wm2_sel
                const_spec((1, OUT_W)),                                    # b_scal
                const_spec((SPH_HID, OUT_W)),                              # w_sph2
                const_spec((1, OUT_W)),                                    # b_sph2
            ],
            out_specs=pl.BlockSpec((1, n_mol_p, OUT_W), lambda t: (t, 0, 0)),
        ),
        compiler_params=pltpu.CompilerParams(
            # TODO(synk): on v7x, if xprof shows one busy TensorCore, switch this
            # axis to pltpu.CORE_PARALLEL.
            dimension_semantics=("parallel",),
            vmem_limit_bytes=48 * 1024 * 1024,
        ),
        cost_estimate=cost,
    )(batch_row, x_scalar, x_spherical,
      wm1, bm1, w_sph1, b_sph1, fold, expand, wm2_sel, b_scal, w_sph2, b_sph2)

    # ---- O(n_mol) epilogue in plain XLA: reduce partials, assemble 3x3 --------
    mol = jnp.sum(partials, axis=0)[:n_mol, :6]                            # (n_mol, 6)
    zero = mol[:, 0]
    dxy, dyz, dz2, dzx, dx2y2 = mol[:, 1], mol[:, 2], mol[:, 3], mol[:, 4], mol[:, 5]
    d_norm = jnp.sqrt(dxy * dxy + dyz * dyz + dz2 * dz2 + dzx * dzx + dx2y2 * dx2y2)
    c = 1.0 / math.sqrt(3.0)
    xx = zero + c * (d_norm - dz2) + dx2y2
    yy = zero + c * (d_norm - dz2) - dx2y2
    zz = zero + c * (d_norm + 2.0 * dz2)
    res = jnp.stack([
        jnp.stack([xx, dxy, dzx], axis=-1),
        jnp.stack([dxy, yy, dyz], axis=-1),
        jnp.stack([dzx, dyz, zz], axis=-1),
    ], axis=-2)                                                            # (n_mol, 3, 3)
    if output_dim == 1:
        res = jnp.trace(res, axis1=-2, axis2=-1)[:, None] / 3.0
    return res


def polar_out_reference(x_scalar, x_spherical, batch, params, n_mol):
    """Plain-JAX f32 reference implementing the same math (sanity check)."""
    p = params
    h = x_scalar @ p["wm1"] + p["bm1"]
    h = h * jax.nn.sigmoid(h)
    scal = h @ p["wm2"] + p["bm2"]
    x0 = x_spherical[:, :EDGE_0E]
    x2 = x_spherical[:, EDGE_0E + EDGE_1O:].reshape(-1, EDGE_2E_MUL, L2_DIM)
    h0 = x0 @ p["w0a"] + p["b0a"]
    h2 = jnp.einsum("nmi,mk->nki", x2, p["w2a"])
    h0g = h0 * jax.nn.sigmoid(jnp.sqrt(h0 ** 2 + EPS2))
    n2 = jnp.sqrt(jnp.sum(h2 ** 2, axis=-1) + EPS2)
    h2g = h2 * jax.nn.sigmoid(n2)[:, :, None]
    s0 = h0g @ p["w0b"] + p["b0b"]
    s2 = jnp.einsum("nki,k->ni", h2g, p["w2b"][:, 0])
    atom = jnp.concatenate([s0 * scal[:, 0:1], s2 * scal[:, 1:2]], axis=1)
    mol = jax.ops.segment_sum(atom, batch, num_segments=n_mol)
    zero = mol[:, 0]
    dxy, dyz, dz2, dzx, dx2y2 = mol[:, 1], mol[:, 2], mol[:, 3], mol[:, 4], mol[:, 5]
    d_norm = jnp.linalg.norm(mol[:, 1:6], axis=-1)
    c = 1.0 / math.sqrt(3.0)
    res = jnp.zeros((n_mol, 3, 3), jnp.float32)
    res = res.at[:, 0, 0].set(zero + c * (d_norm - dz2) + dx2y2)
    res = res.at[:, 1, 1].set(zero + c * (d_norm - dz2) - dx2y2)
    res = res.at[:, 2, 2].set(zero + c * (d_norm + 2.0 * dz2))
    res = res.at[:, 0, 1].set(dxy)
    res = res.at[:, 1, 0].set(dxy)
    res = res.at[:, 1, 2].set(dyz)
    res = res.at[:, 2, 1].set(dyz)
    res = res.at[:, 0, 2].set(dzx)
    res = res.at[:, 2, 0].set(dzx)
    return res


if __name__ == "__main__":
    key = jax.random.PRNGKey(0)
    k1, k2, kp = jax.random.split(key, 3)

    # small demo: N not a multiple of the tile (exercises the tail mask), several
    # tiles (exercises partial accumulation), nonzero biases (exercises the bias
    # path).  Production default is tile_n=2048 (4096 on v6e if VMEM allows).
    N, n_mol = 300, 4
    x_scalar = jax.random.normal(k1, (N, NODE_DIM), jnp.float32)
    x_spherical = jax.random.normal(k2, (N, EDGE_DIM), jnp.float32)
    sizes = (80, 70, 90, 60)                                   # atoms per molecule, sum = 300
    batch = jnp.concatenate(
        [jnp.full((s,), i, jnp.int32) for i, s in enumerate(sizes)])
    params = init_params(kp, zero_biases=False)

    res = polar_out_forward(x_scalar, x_spherical, batch, params, n_mol, tile_n=128)
    res = jax.block_until_ready(res)

    ref = polar_out_reference(x_scalar, x_spherical, batch, params, n_mol)
    assert res.shape == (n_mol, 3, 3)
    assert bool(jnp.all(jnp.isfinite(res)))
    err = float(jnp.max(jnp.abs(res - ref)))
    scale = float(jnp.max(jnp.abs(ref)))
    tol = 5e-2 * max(1.0, scale)        # bf16 MXU inputs, f32 accumulation
    if err > tol:
        raise AssertionError(f"kernel/reference mismatch, max abs err = {err} (tol {tol})")
    print("KERNEL_OK")
</pallas_src>

<mosaic_0001>
module attributes {stable_mosaic.version = 11 : i64} {
  func.func @_polar_kernel(%arg0: i32, %arg1: memref<1x128xi32, #tpu.memory_space<vmem>>, %arg2: memref<128x128xf32, #tpu.memory_space<vmem>>, %arg3: memref<128x480xf32, #tpu.memory_space<vmem>>, %arg4: memref<128x64xbf16, #tpu.memory_space<vmem>>, %arg5: memref<1x64xf32, #tpu.memory_space<vmem>>, %arg6: memref<480x144xbf16, #tpu.memory_space<vmem>>, %arg7: memref<1x144xf32, #tpu.memory_space<vmem>>, %arg8: memref<144x16xf32, #tpu.memory_space<vmem>>, %arg9: memref<16x144xf32, #tpu.memory_space<vmem>>, %arg10: memref<64x128xbf16, #tpu.memory_space<vmem>>, %arg11: memref<1x128xf32, #tpu.memory_space<vmem>>, %arg12: memref<144x128xbf16, #tpu.memory_space<vmem>>, %arg13: memref<1x128xf32, #tpu.memory_space<vmem>>, %arg14: memref<1x128x128xf32, #tpu.memory_space<vmem>>) attributes {dimension_semantics = [#tpu.dimension_semantics<parallel>], iteration_bounds = array<i64: 3>, scalar_prefetch = 0 : i64, scratch_operands = 0 : i64, tpu.core_type = #tpu.core_type<tc>, window_params = [{transform_indices = @transform_0, window_bounds = array<i64: 1, 128>}, {transform_indices = @transform_1, window_bounds = array<i64: 128, 128>}, {transform_indices = @transform_2, window_bounds = array<i64: 128, 480>}, {pipeline_mode = #tpu.pipeline_mode<synchronous>, transform_indices = @transform_3, window_bounds = array<i64: 128, 64>}, {pipeline_mode = #tpu.pipeline_mode<synchronous>, transform_indices = @transform_4, window_bounds = array<i64: 1, 64>}, {pipeline_mode = #tpu.pipeline_mode<synchronous>, transform_indices = @transform_5, window_bounds = array<i64: 480, 144>}, {pipeline_mode = #tpu.pipeline_mode<synchronous>, transform_indices = @transform_6, window_bounds = array<i64: 1, 144>}, {pipeline_mode = #tpu.pipeline_mode<synchronous>, transform_indices = @transform_7, window_bounds = array<i64: 144, 16>}, {pipeline_mode = #tpu.pipeline_mode<synchronous>, transform_indices = @transform_8, window_bounds = array<i64: 16, 144>}, {pipeline_mode = #tpu.pipeline_mode<synchronous>, transform_indices = @transform_9, window_bounds = array<i64: 64, 128>}, {pipeline_mode = #tpu.pipeline_mode<synchronous>, transform_indices = @transform_10, window_bounds = array<i64: 1, 128>}, {pipeline_mode = #tpu.pipeline_mode<synchronous>, transform_indices = @transform_11, window_bounds = array<i64: 144, 128>}, {pipeline_mode = #tpu.pipeline_mode<synchronous>, transform_indices = @transform_12, window_bounds = array<i64: 1, 128>}, {transform_indices = @transform_13, window_bounds = array<i64: 1, 128, 128>}]} {
    %c0 = arith.constant 0 : index
    %c0_0 = arith.constant 0 : index
    %0 = vector.load %arg2[%c0, %c0_0] : memref<128x128xf32, #tpu.memory_space<vmem>>, vector<128x128xf32>
    %1 = arith.truncf %0 : vector<128x128xf32> to vector<128x128xbf16>
    %c0_1 = arith.constant 0 : index
    %c0_2 = arith.constant 0 : index
    %2 = vector.load %arg3[%c0_1, %c0_2] : memref<128x480xf32, #tpu.memory_space<vmem>>, vector<128x480xf32>
    %3 = arith.truncf %2 : vector<128x480xf32> to vector<128x480xbf16>
    %c0_3 = arith.constant 0 : index
    %c0_4 = arith.constant 0 : index
    %4 = vector.load %arg4[%c0_3, %c0_4] : memref<128x64xbf16, #tpu.memory_space<vmem>>, vector<128x64xbf16>
    %cst = arith.constant dense<0.000000e+00> : vector<128x64xf32>
    %5 = tpu.matmul %1, %4, %cst {dimension_numbers = #tpu.dot_dimension_numbers<[1], [0], [0], [1], [0, 0, 1, 1], [], []>} : vector<128x128xbf16>, vector<128x64xbf16>, vector<128x64xf32> -> vector<128x64xf32>
    %c0_5 = arith.constant 0 : index
    %c0_6 = arith.constant 0 : index
    %6 = vector.load %arg5[%c0_5, %c0_6] : memref<1x64xf32, #tpu.memory_space<vmem>>, vector<1x64xf32>
    %7 = vector.broadcast %6 : vector<1x64xf32> to vector<128x64xf32>
    %8 = arith.addf %5, %7 : vector<128x64xf32>
    %c0_7 = arith.constant 0 : index
    %c0_8 = arith.constant 0 : index
    %9 = vector.load %arg6[%c0_7, %c0_8] : memref<480x144xbf16, #tpu.memory_space<vmem>>, vector<480x144xbf16>
    %cst_9 = arith.constant dense<0.000000e+00> : vector<128x144xf32>
    %10 = tpu.matmul %3, %9, %cst_9 {dimension_numbers = #tpu.dot_dimension_numbers<[1], [0], [0], [1], [0, 0, 1, 1], [], []>} : vector<128x480xbf16>, vector<480x144xbf16>, vector<128x144xf32> -> vector<128x144xf32>
    %c0_10 = arith.constant 0 : index
    %c0_11 = arith.constant 0 : index
    %11 = vector.load %arg7[%c0_10, %c0_11] : memref<1x144xf32, #tpu.memory_space<vmem>>, vector<1x144xf32>
    %12 = vector.broadcast %11 : vector<1x144xf32> to vector<128x144xf32>
    %13 = arith.addf %10, %12 : vector<128x144xf32>
    %14 = arith.negf %8 : vector<128x64xf32>
    %15 = math.exp %14 : vector<128x64xf32>
    %cst_12 = arith.constant 1.000000e+00 : f32
    %16 = vector.broadcast %cst_12 : f32 to vector<128x64xf32>
    %17 = arith.addf %16, %15 : vector<128x64xf32>
    %18 = arith.divf %16, %17 : vector<128x64xf32>
    %19 = arith.mulf %8, %18 : vector<128x64xf32>
    %20 = arith.mulf %13, %13 : vector<128x144xf32>
    %c0_13 = arith.constant 0 : index
    %c0_14 = arith.constant 0 : index
    %21 = vector.load %arg8[%c0_13, %c0_14] : memref<144x16xf32, #tpu.memory_space<vmem>>, vector<144x16xf32>
    %cst_15 = arith.constant dense<0.000000e+00> : vector<128x16xf32>
    %22 = tpu.matmul %20, %21, %cst_15 {dimension_numbers = #tpu.dot_dimension_numbers<[1], [0], [0], [1], [0, 0, 1, 1], [], []>} : vector<128x144xf32>, vector<144x16xf32>, vector<128x16xf32> -> vector<128x16xf32>
    %cst_16 = arith.constant 9.99999996E-13 : f32
    %23 = vector.broadcast %cst_16 : f32 to vector<128x16xf32>
    %24 = arith.addf %22, %23 : vector<128x16xf32>
    %25 = math.sqrt %24 : vector<128x16xf32>
    %26 = arith.negf %25 : vector<128x16xf32>
    %27 = math.exp %26 : vector<128x16xf32>
    %cst_17 = arith.constant 1.000000e+00 : f32
    %28 = vector.broadcast %cst_17 : f32 to vector<128x16xf32>
    %29 = arith.addf %28, %27 : vector<128x16xf32>
    %30 = arith.divf %28, %29 : vector<128x16xf32>
    %c0_18 = arith.constant 0 : index
    %c0_19 = arith.constant 0 : index
    %31 = vector.load %arg9[%c0_18, %c0_19] : memref<16x144xf32, #tpu.memory_space<vmem>>, vector<16x144xf32>
    %cst_20 = arith.constant dense<0.000000e+00> : vector<128x144xf32>
    %32 = tpu.matmul %30, %31, %cst_20 {dimension_numbers = #tpu.dot_dimension_numbers<[1], [0], [0], [1], [0, 0, 1, 1], [], []>} : vector<128x16xf32>, vector<16x144xf32>, vector<128x144xf32> -> vector<128x144xf32>
    %33 = tpu.iota {dimensions = array<i32: 1>} : vector<128x144xi32>
    %c64_i32 = arith.constant 64 : i32
    %34 = vector.broadcast %c64_i32 : i32 to vector<128x144xi32>
    %35 = arith.cmpi slt, %33, %34 : vector<128x144xi32>
    %36 = math.absf %13 : vector<128x144xf32>
    %37 = arith.negf %36 : vector<128x144xf32>
    %38 = math.exp %37 : vector<128x144xf32>
    %cst_21 = arith.constant 1.000000e+00 : f32
    %39 = vector.broadcast %cst_21 : f32 to vector<128x144xf32>
    %40 = arith.addf %39, %38 : vector<128x144xf32>
    %41 = arith.divf %39, %40 : vector<128x144xf32>
    %42 = arith.select %35, %41, %32 : vector<128x144xi1>, vector<128x144xf32>
    %43 = arith.mulf %13, %42 : vector<128x144xf32>
    %44 = arith.truncf %43 : vector<128x144xf32> to vector<128x144xbf16>
    %45 = arith.truncf %19 : vector<128x64xf32> to vector<128x64xbf16>
    %c0_22 = arith.constant 0 : index
    %c0_23 = arith.constant 0 : index
    %46 = vector.load %arg10[%c0_22, %c0_23] : memref<64x128xbf16, #tpu.memory_space<vmem>>, vector<64x128xbf16>
    %cst_24 = arith.constant dense<0.000000e+00> : vector<128x128xf32>
    %47 = tpu.matmul %45, %46, %cst_24 {dimension_numbers = #tpu.dot_dimension_numbers<[1], [0], [0], [1], [0, 0, 1, 1], [], []>} : vector<128x64xbf16>, vector<64x128xbf16>, vector<128x128xf32> -> vector<128x128xf32>
    %c0_25 = arith.constant 0 : index
    %c0_26 = arith.constant 0 : index
    %48 = vector.load %arg11[%c0_25, %c0_26] : memref<1x128xf32, #tpu.memory_space<vmem>>, vector<1x128xf32>
    %49 = vector.broadcast %48 : vector<1x128xf32> to vector<128x128xf32>
    %50 = arith.addf %47, %49 : vector<128x128xf32>
    %c0_27 = arith.constant 0 : index
    %c0_28 = arith.constant 0 : index
    %51 = vector.load %arg12[%c0_27, %c0_28] : memref<144x128xbf16, #tpu.memory_space<vmem>>, vector<144x128xbf16>
    %cst_29 = arith.constant dense<0.000000e+00> : vector<128x128xf32>
    %52 = tpu.matmul %44, %51, %cst_29 {dimension_numbers = #tpu.dot_dimension_numbers<[1], [0], [0], [1], [0, 0, 1, 1], [], []>} : vector<128x144xbf16>, vector<144x128xbf16>, vector<128x128xf32> -> vector<128x128xf32>
    %c0_30 = arith.constant 0 : index
    %c0_31 = arith.constant 0 : index
    %53 = vector.load %arg13[%c0_30, %c0_31] : memref<1x128xf32, #tpu.memory_space<vmem>>, vector<1x128xf32>
    %54 = vector.broadcast %53 : vector<1x128xf32> to vector<128x128xf32>
    %55 = arith.addf %52, %54 : vector<128x128xf32>
    %56 = arith.mulf %55, %50 : vector<128x128xf32>
    %c128_i32 = arith.constant 128 : i32
    %57 = arith.muli %arg0, %c128_i32 : i32
    %58 = tpu.iota {dimensions = array<i32: 0>} : vector<128x1xi32>
    %59 = vector.broadcast %57 : i32 to vector<128x1xi32>
    %60 = arith.addi %59, %58 : vector<128x1xi32>
    %c300_i32 = arith.constant 300 : i32
    %61 = vector.broadcast %c300_i32 : i32 to vector<128x1xi32>
    %62 = arith.cmpi slt, %60, %61 : vector<128x1xi32>
    %cst_32 = arith.constant 0.000000e+00 : f32
    %63 = vector.shape_cast %62 : vector<128x1xi1> to vector<128x1xi1>
    %64 = vector.broadcast %63 : vector<128x1xi1> to vector<128x128xi1>
    %65 = vector.broadcast %cst_32 : f32 to vector<128x128xf32>
    %66 = arith.select %64, %56, %65 : vector<128x128xi1>, vector<128x128xf32>
    %c0_33 = arith.constant 0 : index
    %c0_34 = arith.constant 0 : index
    %67 = vector.load %arg1[%c0_33, %c0_34] : memref<1x128xi32, #tpu.memory_space<vmem>>, vector<1x128xi32>
    %68 = tpu.iota {dimensions = array<i32: 0>} : vector<128x128xi32>
    %69 = vector.broadcast %67 : vector<1x128xi32> to vector<128x128xi32>
    %70 = arith.cmpi eq, %68, %69 : vector<128x128xi32>
    %71 = arith.extui %70 : vector<128x128xi1> to vector<128x128xi32>
    %72 = arith.sitofp %71 : vector<128x128xi32> to vector<128x128xf32>
    %cst_35 = arith.constant dense<0.000000e+00> : vector<128x128xf32>
    %73 = tpu.matmul %72, %66, %cst_35 {dimension_numbers = #tpu.dot_dimension_numbers<[1], [0], [0], [1], [0, 0, 1, 1], [], []>} : vector<128x128xf32>, vector<128x128xf32>, vector<128x128xf32> -> vector<128x128xf32>
    %74 = vector.shape_cast %73 : vector<128x128xf32> to vector<1x128x128xf32>
    %c0_36 = arith.constant 0 : index
    %c0_37 = arith.constant 0 : index
    %c0_38 = arith.constant 0 : index
    %75 = vector.load %arg14[%c0_36, %c0_37, %c0_38] : memref<1x128x128xf32, #tpu.memory_space<vmem>>, vector<1x128x128xf32>
    tpu.vector_store %arg14[%c0_36, %c0_37, %c0_38], %74 {strides = array<i32>} : memref<1x128x128xf32, #tpu.memory_space<vmem>>, vector<1x128x128xf32>,
    return
  }
  func.func @transform_0(%arg0: i32) -> (i32, i32) {
    %c0_i32 = arith.constant 0 : i32
    %c0_i32_0 = arith.constant 0 : i32
    return %c0_i32, %arg0 : i32, i32
  }
  func.func @transform_1(%arg0: i32) -> (i32, i32) {
    %c0_i32 = arith.constant 0 : i32
    %c0_i32_0 = arith.constant 0 : i32
    return %arg0, %c0_i32 : i32, i32
  }
  func.func @transform_2(%arg0: i32) -> (i32, i32) {
    %c0_i32 = arith.constant 0 : i32
    %c0_i32_0 = arith.constant 0 : i32
    return %arg0, %c0_i32 : i32, i32
  }
  func.func @transform_3(%arg0: i32) -> (i32, i32) {
    %c0_i32 = arith.constant 0 : i32
    %c0_i32_0 = arith.constant 0 : i32
    %c0_i32_1 = arith.constant 0 : i32
    return %c0_i32, %c0_i32_0 : i32, i32
  }
  func.func @transform_4(%arg0: i32) -> (i32, i32) {
    %c0_i32 = arith.constant 0 : i32
    %c0_i32_0 = arith.constant 0 : i32
    %c0_i32_1 = arith.constant 0 : i32
    return %c0_i32, %c0_i32_0 : i32, i32
  }
  func.func @transform_5(%arg0: i32) -> (i32, i32) {
    %c0_i32 = arith.constant 0 : i32
    %c0_i32_0 = arith.constant 0 : i32
    %c0_i32_1 = arith.constant 0 : i32
    return %c0_i32, %c0_i32_0 : i32, i32
  }
  func.func @transform_6(%arg0: i32) -> (i32, i32) {
    %c0_i32 = arith.constant 0 : i32
    %c0_i32_0 = arith.constant 0 : i32
    %c0_i32_1 = arith.constant 0 : i32
    return %c0_i32, %c0_i32_0 : i32, i32
  }
  func.func @transform_7(%arg0: i32) -> (i32, i32) {
    %c0_i32 = arith.constant 0 : i32
    %c0_i32_0 = arith.constant 0 : i32
    %c0_i32_1 = arith.constant 0 : i32
    return %c0_i32, %c0_i32_0 : i32, i32
  }
  func.func @transform_8(%arg0: i32) -> (i32, i32) {
    %c0_i32 = arith.constant 0 : i32
    %c0_i32_0 = arith.constant 0 : i32
    %c0_i32_1 = arith.constant 0 : i32
    return %c0_i32, %c0_i32_0 : i32, i32
  }
  func.func @transform_9(%arg0: i32) -> (i32, i32) {
    %c0_i32 = arith.constant 0 : i32
    %c0_i32_0 = arith.constant 0 : i32
    %c0_i32_1 = arith.constant 0 : i32
    return %c0_i32, %c0_i32_0 : i32, i32
  }
  func.func @transform_10(%arg0: i32) -> (i32, i32) {
    %c0_i32 = arith.constant 0 : i32
    %c0_i32_0 = arith.constant 0 : i32
    %c0_i32_1 = arith.constant 0 : i32
    return %c0_i32, %c0_i32_0 : i32, i32
  }
  func.func @transform_11(%arg0: i32) -> (i32, i32) {
    %c0_i32 = arith.constant 0 : i32
    %c0_i32_0 = arith.constant 0 : i32
    %c0_i32_1 = arith.constant 0 : i32
    return %c0_i32, %c0_i32_0 : i32, i32
  }
  func.func @transform_12(%arg0: i32) -> (i32, i32) {
    %c0_i32 = arith.constant 0 : i32
    %c0_i32_0 = arith.constant 0 : i32
    %c0_i32_1 = arith.constant 0 : i32
    return %c0_i32, %c0_i32_0 : i32, i32
  }
  func.func @transform_13(%arg0: i32) -> (i32, i32, i32) {
    %c0_i32 = arith.constant 0 : i32
    %c0_i32_0 = arith.constant 0 : i32
    %c0_i32_1 = arith.constant 0 : i32
    return %arg0, %c0_i32, %c0_i32_0 : i32, i32, i32
  }
}

</mosaic_0001>

<bundles_post_ra>
// kernel: tpu_custom_call.1
= control target key start
LH: loop header
LB: loop body
LE: loop exit
PB: predicated region body
PF: predicated region fallthrough
CT: control target
= control target key end

     0   :  { %s5798_s0 = inlined_call_operand.vmem [shape: s32[1,300], index: 0, kind: input, shape index: {}]   ;;  %s5799_s1 = inlined_call_operand.vmem [shape: f32[300,128], index: 1, kind: input, shape index: {}]   ;;  %s5800_s2 = inlined_call_operand.hbm [shape: f32[300,480], index: 2, kind: input, shape index: {}]   ;;  %s5801_s3 = inlined_call_operand.vmem [shape: bf16[128,64], index: 3, kind: input, shape index: {}]   ;;  %s5802_s4 = inlined_call_operand.vmem [shape: f32[1,64], index: 4, kind: input, shape index: {}]   ;;  %s5803_s5 = inlined_call_operand.vmem [shape: bf16[480,144], index: 5, kind: input, shape index: {}]   ;;  %s5804_s6 = inlined_call_operand.vmem [shape: f32[1,144], index: 6, kind: input, shape index: {}]   ;;  %s5805_s7 = inlined_call_operand.vmem [shape: f32[144,16], index: 7, kind: input, shape index: {}]   ;;  %s5806_s8 = inlined_call_operand.vmem [shape: f32[16,144], index: 8, kind: input, shape index: {}]   ;;  %s5807_s9 = inlined_call_operand.vmem [shape: bf16[64,128], index: 9, kind: input, shape index: {}]   ;;  %s5808_s10 = inlined_call_operand.vmem [shape: f32[1,128], index: 10, kind: input, shape index: {}]   ;;  %s5809_s11 = inlined_call_operand.vmem [shape: bf16[144,128], index: 11, kind: input, shape index: {}]   ;;  %s5810_s12 = inlined_call_operand.vmem [shape: f32[1,128], index: 12, kind: input, shape index: {}]   ;;  %s5811_s13 = inlined_call_operand.hbm [shape: f32[3,128,128], index: 13, kind: output, shape index: {}]  }
   0x1   :  { %5823 = sst [smem:[#allocation20_spill]] %s5811_s13 }
   0x2   :  { %18 = vsyncpa [#allocation3], 0 }
   0x3   :  { %20 = vsyncpa [#allocation3 + $0x1], 0 }
   0x4   :  { %21 = vsyncpa [#allocation4], 0 }
   0x5   :  { %23 = vsyncpa [#allocation4 + $0x1], 0  ;;  %s4487_s25 = smov 0   ;;  %s4489_s26 = smov 0  }
   0x6   :  { %s4491_s27 = smov 0   ;;  %s4493_s28 = smov 0  }
   0x7 LB: > { %5824 = sst [smem:[#allocation8_spill]] %s4393_s25  ;;  %s4508_s29 = sadd.s32 4294967295, %s4405_s28   ;;  %s4405_s28 = sphi %s4493_s28, %s5853_s28   ;;  %s4401_s27 = sphi %s4491_s27, %s5855_s27   ;;  %s4397_s26 = sphi %s4489_s26, %s5857_s26   ;;  %s4393_s25 = sphi %s4487_s25, %s5856_s25  }
   0x8   : > { %5825 = sst [smem:[#allocation9_spill]] %s4401_s27  ;;  %s3333_s30 = sadd.s32 4294967294, %s4405_s28  }
   0x9   : > { %s4512_s14 = sadd.s32 1, %s4405_s28   ;;  %s88_s15 = sadd.s32 1, %s4401_s27 }
   0xa   : > { %5826 = sst [smem:[#allocation10_spill]] %s4512_s14  ;;  %s85_s16 = ssub.s32 %s4405_s28, %s4512_s14 }
   0xb   : > { %p95_p0 = scmp.ne.s32.totalorder %s4401_s27, %s4397_s26  ;;  %p86_p1 = scmp.eq.s32.totalorder %s85_s16, 0 }
   0xc   : > { %p96_p2 = scmp.eq.s32.totalorder %s4405_s28, 0  ;;  %p101_p3 = scmp.ne.s32.totalorder %s4397_s26, %s4393_s25 }
   0xd   : > { %p102_p4 = scmp.eq.s32.totalorder %s4508_s29, 0  ;;  %p335_p7 = scmp.eq.s32.totalorder %s4508_s29, 2 }
   0xe   : > { %s4524_s17 = scalar_select %p86_p1, %s4401_s27, %s88_s15  }
   0xf   : > { %p97_p5 = por %p96_p2, %p95_p0  ;;  %p4526_p6 = por %p102_p4, %p101_p3 }
  0x10   : > { %5827 = sst [smem:[#allocation11_spill]] %s4524_s17  ;;  %p341_p8 = scmp.eq.s32.totalorder %s3333_s30, 2 }
  0x11   : > { %p4531_p9 = por %p335_p7, %p95_p0  ;;  %p3335_p11 = scmp.ge.s32.totalorder %s4405_s28, 3 }
  0x12   : > { %p4535_p10 = por %p341_p8, %p101_p3 }
  0x13   : > { %387 = sbr.rel (%p3335_p11) target bundleno = 61 (0x3d), region = 56 }
  0x14   : > { %s5830_s20 = scalar_select %p4535_p10, 1, 0 }
  0x16   : > { %5831 = sst [smem:[#allocation12_spill]] %s5830_s20 }
  0x1a   : > { %413 = sbr.rel (!%p97_p5) target bundleno = 61 (0x3d), region = 68  ;;  %s414_s21 = sand.u32 (%p97_p5), 1, %s4401_s27  }
  0x1b   : > { %s3337_s22 = sshll.u32 (%p97_p5), %s4405_s28, 4  ;;  %s3336_s23 = sshll.u32 (%p97_p5), %s414_s21, 9 }
  0x1c   : > { %s420_s24 = ssub.s32 (%p97_p5), 38, %s3337_s22  ;;  %s4545_s16 = scalar_lea.sflag (%p97_p5), [#allocation3], %s414_s21 }
  0x1d   : > { %p421_p12 = scmp.lt.s32.totalorder (%p97_p5), %s420_s24, 16  ;;  %s418_s17 = scalar_lea.vmem (%p97_p5), [#allocation2], %s3336_s23 }
  0x21   : > { %s5859_s24 = smov (!%p421_p12, %s420_s24), 16 }
  0x22   : > { %s4542_s30 = sshll.u32 %s5859_s24, 9 }
  0x23   : > { %s426_s15 = ssub.s32 8192, %s4542_s30 }
  0x24   : > { %427 = vsyncadd %s4545_s16, %s426_s15  ;;  %p3340_p13 = scmp.ne.s32.totalorder %s4542_s30, 0  ;;  %s3611_s27 = sshll.u32 %s4405_s28, 13 }
  0x25   : > { %s4553_s22 = scalar_lea.hbm %s5800_s2, %s3611_s27  ;;  %s433_s21 = sshll.u32 %s418_s17, 4  ;;  %s4555_s21 = int_to_ptr.vmem [resolvable:$true] %s433_s21 }
  0x26   : > { %s4311_s23 = scalar_lea.hbm %s4553_s22, %s4542_s30  ;;  %s4315_s25 = scalar_lea.hbm %s5800_s2, 19456 }
  0x27   : > { %p4312_p0 = scmp.ne.s32.totalorder %s4553_s22, %s4311_s23  ;;  %p4316_p3 = scmp.lt.u32.totalorder %s4553_s22, %s5800_s2 }
  0x28   : > { %p4317_p4 = scmp.lt.u32.totalorder %s4315_s25, %s4311_s23  ;;  %p4319_p7 = scmp.lt.u32.totalorder %s4311_s23, %s4553_s22 }
  0x29   : > { %p4313_p1 = pnand %p4312_p0, %p3340_p13 }
  0x2a   : > { %p4318_p5 = por %p4317_p4, %p4316_p3 }
  0x2b   : > { %p4314_p2 = pneg %p4313_p1 }
  0x2c   : > { %p4320_p8 = por %p4319_p7, %p4318_p5 }
  0x2e   : > { %p4321_p11 = pnand %p4320_p8, %p4314_p2 }
  0x30   : > { %4324 = shalt.err (!%p4321_p11)
}
  0x31   : > { %s4325_s27 = scalar_lea.vmem %s4555_s21, %s4542_s30  ;;  %s4407_s17 = smov [#allocation2]  }
  0x32   : > { %p4326_p12 = scmp.ne.s32.totalorder %s4555_s21, %s4325_s27  ;;  %s4329_s20 = sshll.u32 %s4407_s17, 4  ;;  %s4330_s20 = int_to_ptr.vmem [resolvable:$false] %s4329_s20 }
  0x33   : > { %s4331_s13 = scalar_lea.vmem %s4330_s20, 16384  ;;  %p4332_p10 = scmp.lt.s32.totalorder %s4555_s21, %s4330_s20 }
  0x34   : > { %p4327_p0 = pnand %p4326_p12, %p3340_p13  ;;  %p4333_p3 = scmp.lt.s32.totalorder %s4331_s13, %s4325_s27 }
  0x36   : > { %p4328_p1 = pneg %p4327_p0  ;;  %p4334_p4 = por %p4333_p3, %p4332_p10 }
  0x38   : > { %p4335_p5 = pnand %p4334_p4, %p4328_p1 }
  0x3a   : > { %4338 = shalt.err (!%p4335_p5)
}
  0x3b   : > { %s4408_s25 = smov 512   ;;  %s4409_s23 = smov 32  }
  0x3c   : > { %439 = dma.hbm_to_vmem [thread:$0]  (%p3340_p13), %s4553_s22, %s4542_s30, %s4555_s21, %s4545_s16, %s4408_s25, %s4408_s25, %s4409_s23  }
  0x3d PF: > { %p3345_p2 = scmp.ge.s32.totalorder %s4405_s28, 1  ;;  %p441_p7 = scmp.lt.s32.totalorder %s4405_s28, 4 }
  0x3f   : > { %p442_p8 = pnand %p3345_p2, %p441_p7 }
  0x41   : > { %445 = sbr.rel (%p442_p8) target bundleno = 1436 (0x59c), region = 72 }
  0x48   : > { %s4585_s24 = sand.u32 1, %s4397_s26  }
  0x49   : > { %s3346_s15 = sshll.u32 %s4585_s24, 9  ;;  %s448_s14 = scalar_lea.sflag [#allocation3], %s4585_s24 }
  0x4a   : > { %s4589_s27 = scalar_lea.vmem [#allocation2], %s3346_s15 }
  0x4b   : > { %4384 = dma.done.wait (%p4526_p6), %s448_s14, 8192  }
  0x4c   : > { %4386 = vsyncadd (%p4526_p6), %s448_s14, 4294959104  ;;  %v3976_v0 = vld [vmem:[%s5803_s5 + $0x4] ss:$8 sps:$4 sm:$0xff]   ;;  %v3978_v1 = vld [vmem:[%s5803_s5] ss:$8 sps:$4 sm:$0xff]   ;;  %s3348_s22 = sshll.u32 %s4508_s29, 4 }
  0x4d   : > { %1215 = vmatprep.subr.bf16.mxu1 %v3976_v0  ;;  %v3979_v2 = vld [vmem:[%s5803_s5 + $0x14] ss:$8 sps:$4 sm:$0xff]   ;;  %v3981_v3 = vld [vmem:[%s5803_s5 + $0x10] ss:$8 sps:$4 sm:$0xff]   ;;  %v3982_v4 = vld [vmem:[%s5803_s5 + $0x24] ss:$8 sps:$4 sm:$0xff]  }
  0x4e   : > { %1216 = vmatpush1.bf16.msra.mxu1 %v3978_v1  ;;  %v3984_v5 = vld [vmem:[%s5803_s5 + $0x20] ss:$8 sps:$4 sm:$0xff]   ;;  %v3985_v6 = vld [vmem:[%s5803_s5 + $0x34] ss:$8 sps:$4 sm:$0xff]   ;;  %v3987_v7 = vld [vmem:[%s5803_s5 + $0x30] ss:$8 sps:$4 sm:$0xff]  }
  0x4f   : > { %1217 = vmatprep.subr.bf16.mxu1 %v3979_v2  ;;  %v3988_v8 = vld [vmem:[%s5803_s5 + $0x44] ss:$8 sps:$4 sm:$0xff]   ;;  %v3990_v9 = vld [vmem:[%s5803_s5 + $0x40] ss:$8 sps:$4 sm:$0xff]   ;;  %v3991_v10 = vld [vmem:[%s5803_s5 + $0x54] ss:$8 sps:$4 sm:$0xff]  }
  0x50   : > { %v3993_v11 = vld [vmem:[%s5803_s5 + $0x50] ss:$8 sps:$4 sm:$0xff]   ;;  %v3994_v12 = vld [vmem:[%s5803_s5 + $0x64] ss:$8 sps:$4 sm:$0xff]   ;;  %v3996_v16 = vld [vmem:[%s5803_s5 + $0x60] ss:$8 sps:$4 sm:$0xff]  }
  0x51   : > { %v555_v13 = vld [vmem:[%s4589_s27 + $0x8] sm:$0xff]  ;;  %v3997_v17 = vld [vmem:[%s5803_s5 + $0x74] ss:$8 sps:$4 sm:$0xff]   ;;  %v3999_v18 = vld [vmem:[%s5803_s5 + $0x70] ss:$8 sps:$4 sm:$0xff]   ;;  %p514_p6 = scmp.lt.s32.totalorder %s3348_s22, 37 }
  0x52   : > { %1218 = vmatpush1.bf16.msra.mxu1 %v3981_v3  ;;  %v559_v14 = vld [vmem:[%s4589_s27 + $0x28] sm:$0xff]  ;;  %v4003_v21 = vld [vmem:[%s5803_s5 + $0x94] ss:$8 sps:$4 sm:$0xff]   ;;  %v4005_v22 = vld [vmem:[%s5803_s5 + $0x90] ss:$8 sps:$4 sm:$0xff]   ;;  %vm1190_vm0 = vcmask 785408  }
  0x53   : > { %1219 = vmatprep.subr.bf16.mxu1 %v3982_v4  ;;  %v619_v15 = vpack.c.bf16 %v559_v14, %v555_v13  ;;  %v4000_v19 = vld [vmem:[%s5803_s5 + $0x84] ss:$8 sps:$4 sm:$0xff]   ;;  %v4002_v20 = vld [vmem:[%s5803_s5 + $0x80] ss:$8 sps:$4 sm:$0xff]   ;;  %v4009_v25 = vld [vmem:[%s5803_s5 + $0xb4] ss:$8 sps:$4 sm:$0xff]  }
  0x54   : > { %v4006_v23 = vld [vmem:[%s5803_s5 + $0xa4] ss:$8 sps:$4 sm:$0xff]   ;;  %v4008_v24 = vld [vmem:[%s5803_s5 + $0xa0] ss:$8 sps:$4 sm:$0xff]   ;;  %v4011_v26 = vld [vmem:[%s5803_s5 + $0xb0] ss:$8 sps:$4 sm:$0xff]  }
  0x55   : > { %1247 = vmatprep.mubr.bf16.mxu1 %v619_v15  ;;  %v4012_v27 = vld [vmem:[%s5803_s5 + $0xc4] ss:$8 sps:$4 sm:$0xff]   ;;  %v4014_v28 = vld [vmem:[%s5803_s5 + $0xc0] ss:$8 sps:$4 sm:$0xff]   ;;  %v4015_v29 = vld [vmem:[%s5803_s5 + $0xd4] ss:$8 sps:$4 sm:$0xff]  }
  0x56   : > { %1220 = vmatpush1.bf16.msra.mxu1 %v3984_v5  ;;  %v4017_v30 = vld [vmem:[%s5803_s5 + $0xd0] ss:$8 sps:$4 sm:$0xff]   ;;  %v4018_v31 = vld [vmem:[%s5803_s5 + $0xe4] ss:$8 sps:$4 sm:$0xff]   ;;  %v4020_v32 = vld [vmem:[%s5803_s5 + $0xe0] ss:$8 sps:$4 sm:$0xff]  }
  0x57   : > { %1221 = vmatprep.subr.bf16.mxu1 %v3985_v6  ;;  %v4021_v33 = vld [vmem:[%s5803_s5 + $0xf4] ss:$8 sps:$4 sm:$0xff]   ;;  %v4023_v34 = vld [vmem:[%s5803_s5 + $0xf0] ss:$8 sps:$4 sm:$0xff]   ;;  %v554_v35 = vld [vmem:[%s4589_s27] sm:$0xff]  ;;  %s5861_s22 = smov (!%p514_p6, %s3348_s22), 37 }
  0x58   : > { %v558_v36 = vld [vmem:[%s4589_s27 + $0x20] sm:$0xff]  ;;  %v563_v38 = vld [vmem:[%s4589_s27 + $0x48] sm:$0xff]  ;;  %s3349_s16 = sshll.u32 %s5861_s22, 3  ;;  %v4029_v45 = vld [vmem:[%s5803_s5 + $0x114] ss:$8 sps:$4 sm:$0xff]   ;;  %vm2574_vm1 = vcmask 523264  }
  0x59   : > { %v4026_v37 = vld [vmem:[%s5803_s5 + $0x104] ss:$8 sps:$4 sm:$0xff]   ;;  %v4024_v40 = vld [vmem:[%s5803_s5 + $0x100] ss:$8 sps:$4 sm:$0xff]   ;;  %v618_v41 = vpack.c.bf16 %v558_v36, %v554_v35  ;;  %v4027_v46 = vld [vmem:[%s5803_s5 + $0x110] ss:$8 sps:$4 sm:$0xff]   ;;  %s4727_s30 = scalar_lea.vmem %s5799_s1, %s3349_s16 }
  0x5a   : > { %1222 = vmatpush1.bf16.msra.mxu1 %v3987_v7  ;;  %v567_v39 = vld [vmem:[%s4589_s27 + $0x68] sm:$0xff]  ;;  %v4066_v42 = vld [vmem:[%s5801_s3] sm:$0xff]   ;;  %v4068_v50 = vld [vmem:[%s5801_s3 + $0x10] sm:$0xff]   ;;  %vm1603_vm2 = vcmask 130048   ;;  %p506_p10 = scmp.lt.s32.totalorder %s4508_s29, 2  ;;  %s3554_s25 = sshll.u32 %s4508_s29, 7 }
  0x5b   : > { %1223 = vmatprep.subr.bf16.mxu1 %v3988_v8  ;;  %v623_v43 = vpack.c.bf16 %v567_v39, %v563_v38  ;;  %v4067_v44 = vld [vmem:[%s5801_s3 + $0x8] sm:$0xff]   ;;  %3673 = vmatprep.subr.bf16.mxu0 %v4066_v42  ;;  %v562_v47 = vld [vmem:[%s4589_s27 + $0x40] sm:$0xff]  ;;  %v4069_v56 = vld [vmem:[%s5801_s3 + $0x18] sm:$0xff]   ;;  %s3347_s15 = sshll.u32 %s4585_s24, 7  ;;  %s3612_s21 = sshll.u32 %s4508_s29, 11 }
  0x5c   : > { %v566_v48 = vld [vmem:[%s4589_s27 + $0x60] sm:$0xff]  ;;  %3674 = vmatpush3.bf16.msra.mxu0 %v4066_v42  ;;  %v571_v51 = vld [vmem:[%s4589_s27 + $0x88] sm:$0xff]  ;;  %v4035_v60 = vld [vmem:[%s5803_s5 + $0x134] ss:$8 sps:$4 sm:$0xff]   ;;  %s5730_s14 = scalar_lea.vmem [#allocation5], %s3347_s15  ;;  %s5849_s20 = sld [smem:[#allocation20_spill]] }
  0x5d   : > { %v4032_v49 = vld [vmem:[%s5803_s5 + $0x124] ss:$8 sps:$4 sm:$0xff]   ;;  %3675 = vmatprep.subr.bf16.mxu0 %v4067_v44  ;;  %v622_v55 = vpack.c.bf16 %v566_v48, %v562_v47  ;;  %v4030_v58 = vld [vmem:[%s5803_s5 + $0x120] ss:$8 sps:$4 sm:$0xff]   ;;  %v4033_v62 = vld [vmem:[%s5803_s5 + $0x130] ss:$8 sps:$4 sm:$0xff]  }
  0x5e   : > { %1224 = vmatpush1.bf16.msra.mxu1 %v3990_v9  ;;  %v575_v52 = vld [vmem:[%s4589_s27 + $0xa8] sm:$0xff]  ;;  %v530_v53 = vld [vmem:[%s4727_s30] sm:$0xff]  ;;  %v4041_v8 = vld [vmem:[%s5803_s5 + $0x154] ss:$8 sps:$4 sm:$0xff]   ;;  %s3239_s17 = sshll.u32 %s5730_s14, 4  ;;  %s4414_s18 = smov [#allocation5]   ;;  %s5753_s17 = int_to_ptr.vmem [resolvable:$true] %s3239_s17 }
  0x5f   : > { %1225 = vmatprep.subr.bf16.mxu1 %v3991_v10  ;;  %v531_v54 = vld [vmem:[%s4727_s30 + $0x8] sm:$0xff]  ;;  %v627_v59 = vpack.c.bf16 %v575_v52, %v571_v51  ;;  %v4070_v61 = vld [vmem:[%s5801_s3 + $0x20] sm:$0xff]   ;;  %v4072_v9 = vld [vmem:[%s5801_s3 + $0x30] sm:$0xff]  }
  0x60   : > { %3676 = vmatpush3.bf16.msra.mxu0 %v4067_v44  ;;  %v546_v57 = vpack.c.bf16 %v531_v54, %v530_v53  ;;  %v570_v63 = vld [vmem:[%s4589_s27 + $0x80] sm:$0xff]  ;;  %v579_v2 = vld [vmem:[%s4589_s27 + $0xc8] sm:$0xff]  ;;  %v4039_v10 = vld [vmem:[%s5803_s5 + $0x150] ss:$8 sps:$4 sm:$0xff]  }
  0x61   : > { %3677 = vmatprep.subr.bf16.mxu0 %v4068_v50  ;;  %v574_v0 = vld [vmem:[%s4589_s27 + $0xa0] sm:$0xff]  ;;  %v583_v3 = vld [vmem:[%s4589_s27 + $0xe8] sm:$0xff]  ;;  %v1587_v38 = vld [vmem:[%s5805_s7 + $0x10] sm:$0xff] }
  0x62   : > { %1226 = vmatpush1.bf16.msra.mxu1 %v3993_v11  ;;  %3689 = vmatprep.mubr.bf16.mxu0 %v546_v57  ;;  %v4038_v1 = vld [vmem:[%s5803_s5 + $0x144] ss:$8 sps:$4 sm:$0xff]   ;;  %v626_v4 = vpack.c.bf16 %v574_v0, %v570_v63  ;;  %v4036_v6 = vld [vmem:[%s5803_s5 + $0x140] ss:$8 sps:$4 sm:$0xff]   ;;  %v631_v7 = vpack.c.bf16 %v583_v3, %v579_v2  ;;  %v1588_v39 = vld [vmem:[%s5805_s7 + $0x18] sm:$0xff] }
  0x63   : > { %1227 = vmatprep.subr.bf16.mxu1 %v3994_v12  ;;  %v4071_v5 = vld [vmem:[%s5801_s3 + $0x28] sm:$0xff]   ;;  %v578_v11 = vld [vmem:[%s4589_s27 + $0xc0] sm:$0xff]  ;;  %v4053_v42 = vld [vmem:[%s5803_s5 + $0x194] ss:$8 sps:$4 sm:$0xff]  }
  0x64   : > { %3678 = vmatpush3.bf16.msra.mxu0 %v4068_v50  ;;  %v582_v12 = vld [vmem:[%s4589_s27 + $0xe0] sm:$0xff]  ;;  %v587_v14 = vld [vmem:[%s4589_s27 + $0x108] sm:$0xff]  ;;  %v537_v44 = vld [vmem:[%s4727_s30 + $0x38] sm:$0xff] }
  0x65   : > { %3679 = vmatprep.subr.bf16.mxu0 %v4069_v56  ;;  %v4044_v13 = vld [vmem:[%s5803_s5 + $0x164] ss:$8 sps:$4 sm:$0xff]   ;;  %v4051_v52 = vld [vmem:[%s5803_s5 + $0x190] ss:$8 sps:$4 sm:$0xff]   ;;  %v4059_v0 = vld [vmem:[%s5803_s5 + $0x1b4] ss:$8 sps:$4 sm:$0xff]  }
  0x66   : > { %1228 = vmatpush1.bf16.msra.mxu1 %v3996_v16  ;;  %v591_v15 = vld [vmem:[%s4589_s27 + $0x128] sm:$0xff]  ;;  %v4073_v16 = vld [vmem:[%s5801_s3 + $0x38] sm:$0xff]   ;;  %v1589_v48 = vld [vmem:[%s5805_s7 + $0x20] sm:$0xff] }
  0x67   : > { %1229 = vmatprep.subr.bf16.mxu1 %v3997_v17  ;;  %v4042_v17 = vld [vmem:[%s5803_s5 + $0x160] ss:$8 sps:$4 sm:$0xff]   ;;  %v4056_v53 = vld [vmem:[%s5803_s5 + $0x1a4] ss:$8 sps:$4 sm:$0xff]   ;;  %v541_v2 = vld [vmem:[%s4727_s30 + $0x58] sm:$0xff] }
  0x68   : > { %3680 = vmatpush3.bf16.msra.mxu0 %v4069_v56  ;;  %v539_v47 = vld [vmem:[%s4727_s30 + $0x48] sm:$0xff]  ;;  %v594_v50 = vld [vmem:[%s4589_s27 + $0x140] sm:$0xff] }
  0x69   : > { %3681 = vmatprep.subr.bf16.mxu0 %v4070_v61  ;;  %v598_v51 = vld [vmem:[%s4589_s27 + $0x160] sm:$0xff]  ;;  %v603_v54 = vld [vmem:[%s4589_s27 + $0x188] sm:$0xff] }
  0x6a   : > { %1230 = vmatpush1.bf16.msra.mxu1 %v3999_v18  ;;  %v630_v18 = vpack.c.bf16 %v582_v12, %v578_v11  ;;  %v542_v3 = vld [vmem:[%s4727_s30 + $0x60] sm:$0xff]  ;;  %v611_v11 = vld [vmem:[%s4589_s27 + $0x1c8] sm:$0xff] }
  0x6b   : > { %1231 = vmatprep.subr.bf16.mxu1 %v4000_v19  ;;  %v635_v19 = vpack.c.bf16 %v591_v15, %v587_v14  ;;  %v615_v12 = vld [vmem:[%s4589_s27 + $0x1e8] sm:$0xff] }
  0x6c   : > { %3682 = vmatpush3.bf16.msra.mxu0 %v4070_v61  ;;  %v1592_v61 = vld [vmem:[%s5805_s7 + $0x38] sm:$0xff] }
  0x6d   : > { %3683 = vmatprep.subr.bf16.mxu0 %v4071_v5 }
  0x6e   : > { %1232 = vmatpush1.bf16.msra.mxu1 %v4002_v20  ;;  %v4047_v20 = vld [vmem:[%s5803_s5 + $0x174] ss:$8 sps:$4 sm:$0xff]  }
  0x6f   : > { %1233 = vmatprep.subr.bf16.mxu1 %v4003_v21  ;;  %v532_v21 = vld [vmem:[%s4727_s30 + $0x10] sm:$0xff] }
  0x70   : > { %3684 = vmatpush3.bf16.msra.mxu0 %v4071_v5  ;;  %v543_v5 = vld [vmem:[%s4727_s30 + $0x68] sm:$0xff] }
  0x71   : > { %3685 = vmatprep.subr.bf16.mxu0 %v4072_v9  ;;  %v552_v15 = vpack.c.bf16 %v543_v5, %v542_v3  ;;  %v600_v5 = vld [vmem:[%s4589_s27 + $0x170] sm:$0xff] }
  0x72   : > { %1234 = vmatpush1.bf16.msra.mxu1 %v4005_v22  ;;  %v533_v22 = vld [vmem:[%s4727_s30 + $0x18] sm:$0xff] }
  0x73   : > { %1235 = vmatprep.subr.bf16.mxu1 %v4006_v23  ;;  %v534_v23 = vld [vmem:[%s4727_s30 + $0x20] sm:$0xff] }
  0x74   : > { %3686 = vmatpush3.bf16.msra.mxu0 %v4072_v9  ;;  %v606_v9 = vld [vmem:[%s4589_s27 + $0x1a0] sm:$0xff] }
  0x75   : > { %3687 = vmatprep.subr.bf16.mxu0 %v4073_v16 }
  0x76   : > { %1236 = vmatpush1.bf16.msra.mxu1 %v4008_v24  ;;  %v535_v24 = vld [vmem:[%s4727_s30 + $0x28] sm:$0xff] }
  0x77   : > { %1237 = vmatprep.subr.bf16.mxu1 %v4009_v25  ;;  %v1585_v25 = vld [vmem:[%s5805_s7] sm:$0xff] }
  0x78   : > { %3688 = vmatpush3.bf16.msra.mxu0 %v4073_v16 }
  0x7a   : > { %1238 = vmatpush1.bf16.msra.mxu1 %v4011_v26  ;;  %v1586_v26 = vld [vmem:[%s5805_s7 + $0x8] sm:$0xff] }
  0x7b   : > { %1239 = vmatprep.subr.bf16.mxu1 %v4012_v27  ;;  %v586_v27 = vld [vmem:[%s4589_s27 + $0x100] sm:$0xff]  ;;  %v3786_v35 = vpack.c.bf16 %v1586_v26, %v1585_v25 }
  0x7c   : > { %v1597_v26 = vld [vmem:[%s5805_s7 + $0x60] sm:$0xff] }
  0x7e   : > { %1240 = vmatpush1.bf16.msra.mxu1 %v4014_v28  ;;  %v590_v28 = vld [vmem:[%s4589_s27 + $0x120] sm:$0xff] }
  0x7f   : > { %1241 = vmatprep.subr.bf16.mxu1 %v4015_v29  ;;  %v4045_v29 = vld [vmem:[%s5803_s5 + $0x170] ss:$8 sps:$4 sm:$0xff]   ;;  %v634_v36 = vpack.c.bf16 %v590_v28, %v586_v27  ;;  %v1598_v27 = vld [vmem:[%s5805_s7 + $0x68] sm:$0xff]  ;;  %v610_v28 = vld [vmem:[%s4589_s27 + $0x1c0] sm:$0xff] }
  0x82   : > { %1242 = vmatpush1.bf16.msra.mxu1 %v4017_v30  ;;  %v4050_v30 = vld [vmem:[%s5803_s5 + $0x184] ss:$8 sps:$4 sm:$0xff]  }
  0x83   : > { %1243 = vmatprep.subr.bf16.mxu1 %v4018_v31  ;;  %v595_v31 = vld [vmem:[%s4589_s27 + $0x148] sm:$0xff] }
  0x86   : > { %1244 = vmatpush1.bf16.msra.mxu1 %v4020_v32  ;;  %v599_v32 = vld [vmem:[%s4589_s27 + $0x168] sm:$0xff] }
  0x87   : > { %1245 = vmatprep.subr.bf16.mxu1 %v4021_v33  ;;  %v547_v33 = vpack.c.bf16 %v533_v22, %v532_v21  ;;  %v4060_v21 = vld [vmem:[%s5803_s5 + $0x1c0] ss:$8 sps:$4 sm:$0xff]   ;;  %v4065_v22 = vld [vmem:[%s5803_s5 + $0x1d4] ss:$8 sps:$4 sm:$0xff]  }
  0x89   : > { %3690 = vmatmul.mubr.bf16.vlgmr.msra.gmra.mrb[0].mxu0 %v547_v33 }
  0x8a   : > { %1246 = vmatpush1.bf16.msra.mxu1 %v4023_v34  ;;  %v548_v34 = vpack.c.bf16 %v535_v24, %v534_v23  ;;  %v544_v23 = vld [vmem:[%s4727_s30 + $0x70] sm:$0xff]  ;;  %v545_v24 = vld [vmem:[%s4727_s30 + $0x78] sm:$0xff] }
  0x8b   : > { %1328 = vmatprep.subr.bf16.mxu1 %v4026_v37  ;;  %v4410_v37 = vmov 0.0|0.0   ;;  %v553_v33 = vpack.c.bf16 %v545_v24, %v544_v23  ;;  %v1602_v23 = vld [vmem:[%s5805_s7 + $0x88] sm:$0xff] }
  0x8c   : > { %3785 = vmatprep.subr.bf16.mxu0 %v4410_v37  ;;  %3693 = vmatprep.mubr.bf16.mxu0 %v548_v34  ;;  %v3804_v34 = vpack.c.bf16 %v1598_v27, %v1597_v26  ;;  %v4075_v26 = vld [vmem:[%s5807_s9 + $0x8] sm:$0xff]   ;;  %v2008_v27 = vld [vmem:[%s5806_s8 + $0x18] sm:$0xff] }
  0x8d   : > { %1248 = vmatmul.mubr.bf16.vlgmr.msra.gmra.mrb[0].mxu1 %v618_v41  ;;  %v639_v41 = vpack.c.bf16 %v599_v32, %v595_v31  ;;  %3787 = vmatpush1.bf16.msra.mxu0 %v3786_v35  ;;  %v557_v31 = vld [vmem:[%s4589_s27 + $0x18] sm:$0xff] }
  0x8e   : > { %1329 = vmatpush1.bf16.msra.mxu1 %v4024_v40  ;;  %1257 = vmatprep.mubr.bf16.mxu1 %v623_v43  ;;  %v4048_v40 = vld [vmem:[%s5803_s5 + $0x180] ss:$8 sps:$4 sm:$0xff]   ;;  %v536_v43 = vld [vmem:[%s4727_s30 + $0x30] sm:$0xff]  ;;  %v561_v32 = vld [vmem:[%s4589_s27 + $0x38] sm:$0xff] }
  0x8f   : > { %1330 = vmatprep.subr.bf16.mxu1 %v4029_v45  ;;  %v538_v45 = vld [vmem:[%s4727_s30 + $0x40] sm:$0xff]  ;;  %3788 = vmatprep.subr.bf16.mxu0 %v4410_v37  ;;  %v549_v56 = vpack.c.bf16 %v537_v44, %v536_v43  ;;  %v564_v44 = vld [vmem:[%s4589_s27 + $0x50] sm:$0xff] }
  0x90   : > { %v550_v57 = vpack.c.bf16 %v539_v47, %v538_v45  ;;  %v568_v45 = vld [vmem:[%s4589_s27 + $0x70] sm:$0xff]  ;;  %v577_v47 = vld [vmem:[%s4589_s27 + $0xb8] sm:$0xff] }
  0x91   : > { %3694 = vmatmul.mubr.bf16.gmra.mrb[4].mxu0 %v549_v56  ;;  %v580_v56 = vld [vmem:[%s4589_s27 + $0xd0] sm:$0xff] }
  0x92   : > { %1331 = vmatpush1.bf16.msra.mxu1 %v4027_v46  ;;  %v3789_v46 = vpack.c.bf16 %v1588_v39, %v1587_v38  ;;  %3697 = vmatprep.mubr.bf16.mxu0 %v550_v57  ;;  %v556_v38 = vld [vmem:[%s4589_s27 + $0x10] sm:$0xff] }
  0x93   : > { %1332 = vmatprep.subr.bf16.mxu1 %v4032_v49  ;;  %v1590_v49 = vld [vmem:[%s5805_s7 + $0x28] sm:$0xff]  ;;  %v560_v39 = vld [vmem:[%s4589_s27 + $0x30] sm:$0xff] }
  0x94   : > { %3790 = vmatpush1.bf16.msra.mxu0 %v3789_v46  ;;  %v573_v46 = vld [vmem:[%s4589_s27 + $0x98] sm:$0xff]  ;;  %v584_v57 = vld [vmem:[%s4589_s27 + $0xf0] sm:$0xff] }
  0x95   : > { %1258 = vmatmul.mubr.bf16.gmra.mrb[4].mxu1 %v622_v55  ;;  %v607_v55 = vld [vmem:[%s4589_s27 + $0x1a8] sm:$0xff]  ;;  %3791 = vmatprep.subr.bf16.mxu0 %v4410_v37 }
  0x96   : > { %1333 = vmatpush1.bf16.msra.mxu1 %v4030_v58  ;;  %1267 = vmatprep.mubr.bf16.mxu1 %v627_v59  ;;  %v3792_v58 = vpack.c.bf16 %v1590_v49, %v1589_v48  ;;  %v638_v59 = vpack.c.bf16 %v598_v51, %v594_v50  ;;  %v643_v63 = vpack.c.bf16 %v607_v55, %v603_v54  ;;  %v572_v50 = vld [vmem:[%s4589_s27 + $0x90] sm:$0xff] }
  0x97   : > { %1334 = vmatprep.subr.bf16.mxu1 %v4035_v60  ;;  %v1591_v60 = vld [vmem:[%s5805_s7 + $0x30] sm:$0xff]  ;;  %v624_v48 = vpack.c.bf16 %v568_v45, %v564_v44  ;;  %v629_v49 = vpack.c.bf16 %v577_v47, %v573_v46 }
  0x98   : > { %3793 = vmatpush1.bf16.msra.mxu0 %v3792_v58  ;;  %v576_v51 = vld [vmem:[%s4589_s27 + $0xb0] sm:$0xff]  ;;  %v589_v58 = vld [vmem:[%s4589_s27 + $0x118] sm:$0xff] }
  0x99   : > { %3794 = vmatprep.subr.bf16.mxu0 %v4410_v37  ;;  %v628_v54 = vpack.c.bf16 %v576_v51, %v572_v50 }
  0x9a   : > { %1335 = vmatpush1.bf16.msra.mxu1 %v4033_v62  ;;  %v4054_v62 = vld [vmem:[%s5803_s5 + $0x1a0] ss:$8 sps:$4 sm:$0xff]  }
  0x9b   : > { %1336 = vmatprep.subr.bf16.mxu1 %v4038_v1  ;;  %v540_v1 = vld [vmem:[%s4727_s30 + $0x50] sm:$0xff]  ;;  %s4343_s30 = sshll.u32 %s4414_s18, 4  ;;  %s4344_s30 = int_to_ptr.vmem [resolvable:$false] %s4343_s30 }
  0x9c   : > { %v551_v14 = vpack.c.bf16 %v541_v2, %v540_v1  ;;  %v601_v1 = vld [vmem:[%s4589_s27 + $0x178] sm:$0xff]  ;;  %s4345_s22 = scalar_lea.vmem %s4344_s30, 4096  ;;  %p4346_p0 = scmp.lt.s32.totalorder %s5753_s17, %s4344_s30 }
  0x9d   : > { %1268 = vmatmul.mubr.bf16.gmra.mrb[8].mxu1 %v626_v4  ;;  %v3795_v4 = vpack.c.bf16 %v1592_v61, %v1591_v60  ;;  %v632_v60 = vpack.c.bf16 %v584_v57, %v580_v56 }
  0x9e   : > { %1337 = vmatpush1.bf16.msra.mxu1 %v4036_v6  ;;  %1277 = vmatprep.mubr.bf16.mxu1 %v631_v7  ;;  %v1593_v6 = vld [vmem:[%s5805_s7 + $0x40] sm:$0xff]  ;;  %v1594_v7 = vld [vmem:[%s5805_s7 + $0x48] sm:$0xff] }
  0x9f   : > { %1338 = vmatprep.subr.bf16.mxu1 %v4041_v8  ;;  %v602_v8 = vld [vmem:[%s4589_s27 + $0x180] sm:$0xff]  ;;  %3796 = vmatpush1.bf16.msra.mxu0 %v3795_v4  ;;  %v3798_v16 = vpack.c.bf16 %v1594_v7, %v1593_v6  ;;  %v596_v4 = vld [vmem:[%s4589_s27 + $0x150] sm:$0xff]  ;;  %v605_v6 = vld [vmem:[%s4589_s27 + $0x198] sm:$0xff] }
  0xa0   : > { %3797 = vmatprep.subr.bf16.mxu0 %v4410_v37  ;;  %3698 = vmatmul.mubr.bf16.gmra.mrb[8].mxu0 %v551_v14  ;;  %v609_v7 = vld [vmem:[%s4589_s27 + $0x1b8] sm:$0xff] }
  0xa1   : > { %3701 = vmatprep.mubr.bf16.mxu0 %v552_v15 }
  0xa2   : > { %1339 = vmatpush1.bf16.msra.mxu1 %v4039_v10  ;;  %v4057_v10 = vld [vmem:[%s5803_s5 + $0x1b0] ss:$8 sps:$4 sm:$0xff]  }
  0xa3   : > { %1340 = vmatprep.subr.bf16.mxu1 %v4044_v13  ;;  %v4062_v13 = vld [vmem:[%s5803_s5 + $0x1c4] ss:$8 sps:$4 sm:$0xff]   ;;  %3799 = vmatpush1.bf16.msra.mxu0 %v3798_v16  ;;  %v612_v16 = vld [vmem:[%s4589_s27 + $0x1d0] sm:$0xff] }
  0xa4   : > { %3800 = vmatprep.subr.bf16.mxu0 %v4410_v37 }
  0xa5   : > { %1278 = vmatmul.mubr.bf16.gmra.mrb[12].mxu1 %v630_v18  ;;  %v1595_v18 = vld [vmem:[%s5805_s7 + $0x50] sm:$0xff] }
  0xa6   : > { %1341 = vmatpush1.bf16.msra.mxu1 %v4042_v17  ;;  %1287 = vmatprep.mubr.bf16.mxu1 %v635_v19  ;;  %v642_v17 = vpack.c.bf16 %v606_v9, %v602_v8  ;;  %v1596_v19 = vld [vmem:[%s5805_s7 + $0x58] sm:$0xff]  ;;  %v640_v8 = vpack.c.bf16 %v600_v5, %v596_v4  ;;  %v645_v9 = vpack.c.bf16 %v609_v7, %v605_v6 }
  0xa7   : > { %1342 = vmatprep.subr.bf16.mxu1 %v4047_v20  ;;  %v647_v20 = vpack.c.bf16 %v615_v12, %v611_v11  ;;  %v3801_v25 = vpack.c.bf16 %v1596_v19, %v1595_v18  ;;  %v608_v11 = vld [vmem:[%s4589_s27 + $0x1b0] sm:$0xff]  ;;  %v613_v12 = vld [vmem:[%s4589_s27 + $0x1d8] sm:$0xff] }
  0xa8   : > { %3702 = vmatmul.mubr.bf16.gmra.mrb[12].mxu0 %v553_v33  ;;  %v1599_v19 = vld [vmem:[%s5805_s7 + $0x70] sm:$0xff] }
  0xa9   : > { %3802 = vmatpush1.bf16.msra.mxu0 %v3801_v25  ;;  %v4074_v25 = vld [vmem:[%s5807_s9] sm:$0xff]  }
  0xaa   : > { %1343 = vmatpush1.bf16.msra.mxu1 %v4045_v29  ;;  %v614_v29 = vld [vmem:[%s4589_s27 + $0x1e0] sm:$0xff]  ;;  %3803 = vmatprep.subr.bf16.mxu0 %v4410_v37 }
  0xab   : > { %1344 = vmatprep.subr.bf16.mxu1 %v4050_v30  ;;  %v4063_v30 = vld [vmem:[%s5803_s5 + $0x1d0] ss:$8 sps:$4 sm:$0xff]   ;;  %v646_v35 = vpack.c.bf16 %v614_v29, %v610_v28 }
  0xac   : > { %v4076_v29 = vld [vmem:[%s5807_s9 + $0x10] sm:$0xff]  }
  0xad   : > { %1288 = vmatmul.mubr.bf16.gmra.mrb[16].mxu1 %v634_v36  ;;  %v621_v36 = vpack.c.bf16 %v561_v32, %v557_v31  ;;  %3805 = vmatpush1.bf16.msra.mxu0 %v3804_v34  ;;  %v4977_v31 = vld [vmem:[%s5802_s4] ss:$0 sm:$0xff] }
  0xae   : > { %1345 = vmatpush1.bf16.msra.mxu1 %v4048_v40  ;;  %1297 = vmatprep.mubr.bf16.mxu1 %v639_v41  ;;  %v565_v40 = vld [vmem:[%s4589_s27 + $0x58] sm:$0xff] }
  0xaf   : > { %1346 = vmatprep.subr.bf16.mxu1 %v4053_v42  ;;  %3806 = vmatprep.subr.bf16.mxu0 %v4410_v37  ;;  %v569_v41 = vld [vmem:[%s4589_s27 + $0x78] sm:$0xff]  ;;  %v620_v42 = vpack.c.bf16 %v560_v39, %v556_v38 }
  0xb0   : > { %v625_v43 = vpack.c.bf16 %v569_v41, %v565_v40 }
  0xb2   : > { %1347 = vmatpush1.bf16.msra.mxu1 %v4051_v52  ;;  %v581_v52 = vld [vmem:[%s4589_s27 + $0xd8] sm:$0xff] }
  0xb3   : > { %1348 = vmatprep.subr.bf16.mxu1 %v4056_v53  ;;  %v585_v53 = vld [vmem:[%s4589_s27 + $0xf8] sm:$0xff] }
  0xb4   : > { %v633_v55 = vpack.c.bf16 %v585_v53, %v581_v52 }
  0xb5   : > { %1298 = vmatmul.mubr.bf16.gmra.mrb[20].mxu1 %v638_v59  ;;  %v593_v59 = vld [vmem:[%s4589_s27 + $0x138] sm:$0xff] }
  0xb6   : > { %1307 = vmatprep.mubr.bf16.mxu1 %v643_v63  ;;  %1349 = vmatpush1.bf16.msra.mxu1 %v4054_v62  ;;  %v637_v61 = vpack.c.bf16 %v593_v59, %v589_v58  ;;  %v588_v62 = vld [vmem:[%s4589_s27 + $0x110] sm:$0xff] }
  0xb7   : > { %1350 = vmatprep.subr.bf16.mxu1 %v4059_v0  ;;  %v592_v63 = vld [vmem:[%s4589_s27 + $0x130] sm:$0xff]  ;;  %v597_v0 = vld [vmem:[%s4589_s27 + $0x158] sm:$0xff] }
  0xb8   : > { %v636_v2 = vpack.c.bf16 %v592_v63, %v588_v62  ;;  %v641_v3 = vpack.c.bf16 %v601_v1, %v597_v0 }
  0xba   : > { %1351 = vmatpush1.bf16.msra.mxu1 %v4057_v10  ;;  %v604_v10 = vld [vmem:[%s4589_s27 + $0x190] sm:$0xff] }
  0xbb   : > { %1352 = vmatprep.subr.bf16.mxu1 %v4062_v13  ;;  %v617_v13 = vld [vmem:[%s4589_s27 + $0x1f8] sm:$0xff]  ;;  %v644_v14 = vpack.c.bf16 %v608_v11, %v604_v10 }
  0xbc   : > { %v649_v15 = vpack.c.bf16 %v617_v13, %v613_v12 }
  0xbd   : > { %1308 = vmatmul.mubr.bf16.gmra.mrb[24].mxu1 %v642_v17  ;;  %v616_v17 = vld [vmem:[%s4589_s27 + $0x1f0] sm:$0xff]  ;;  %s507_s27 = scalar_select %p506_p10, %s4508_s29, 2 }
  0xbe   : > { %1317 = vmatprep.mubr.bf16.mxu1 %v647_v20  ;;  %1353 = vmatpush1.bf16.msra.mxu1 %v4060_v21  ;;  %v648_v18 = vpack.c.bf16 %v616_v17, %v612_v16  ;;  %v1600_v20 = vld [vmem:[%s5805_s7 + $0x78] sm:$0xff]  ;;  %s4339_s29 = scalar_lea.vmem %s5753_s17, 2048 }
  0xbf   : > { %1354 = vmatprep.subr.bf16.mxu1 %v4065_v22  ;;  %v3807_v21 = vpack.c.bf16 %v1600_v20, %v1599_v19  ;;  %v1601_v22 = vld [vmem:[%s5805_s7 + $0x80] sm:$0xff]  ;;  %s508_s13 = scalar_lea.vmem %s5798_s0, %s507_s27  ;;  %p4340_p13 = scmp.ne.s32.totalorder %s5753_s17, %s4339_s29 }
  0xc0   : > { %v3810_v24 = vpack.c.bf16 %v1602_v23, %v1601_v22  ;;  %p4347_p1 = scmp.lt.s32.totalorder %s4345_s22, %s4339_s29 }
  0xc1   : > { %3808 = vmatpush1.bf16.msra.mxu0 %v3807_v21  ;;  %p4341_p11 = pnand %p4340_p13, %p4531_p9 }
  0xc2   : > { %1355 = vmatpush1.bf16.msra.mxu1 %v4063_v30  ;;  %3809 = vmatprep.subr.bf16.mxu0 %v4410_v37  ;;  %v2006_v37 = vld [vmem:[%s5806_s8 + $0x8] sm:$0xff]  ;;  %v4077_v30 = vld [vmem:[%s5807_s9 + $0x18] sm:$0xff]   ;;  %p4348_p3 = por %p4347_p1, %p4346_p0 }
  0xc3   : > { %3705 = vmatprep.subr.bf16.mxu1 %v4074_v25  ;;  %v3812_v28 = vpack.c.bf16 %v2008_v27, %v2006_v37  ;;  %p4342_p12 = pneg %p4341_p11 }
  0xc5   : > { %1318 = vmatmul.mubr.bf16.gmra.mrb[28].mxu1 %v646_v35  ;;  %3811 = vmatpush1.bf16.msra.mxu0 %v3810_v24  ;;  %p4349_p4 = pnand %p4348_p3, %p4342_p12 }
  0xc6   : > { %3419 = vmatprep.mubr.msk.bf16.mxu1 %vm1190_vm0, %v621_v36  ;;  %3813 = vmatprep.subr.bf16.mxu0 %v3812_v28 }
  0xcd   : > { %1361 = vmatmul.mubr.bf16.vlgmr.msra.gmra.mrb[0].mxu1 %v620_v42 }
  0xce   : > { %3420 = vmatprep.mubr.msk.bf16.mxu1 %vm1190_vm0, %v625_v43  ;;  %3706 = vmatpush3.bf16.msra.mxu1 %v4074_v25 }
  0xcf   : > { %3707 = vmatprep.subr.bf16.mxu1 %v4075_v26 }
  0xd2   : > { %3708 = vmatpush3.bf16.msra.mxu1 %v4075_v26 }
  0xd3   : > { %3709 = vmatprep.subr.bf16.mxu1 %v4076_v29 }
  0xd5   : > { %1371 = vmatmul.mubr.bf16.gmra.mrb[4].mxu1 %v624_v48 }
  0xd6   : > { %3421 = vmatprep.mubr.msk.bf16.mxu1 %vm1190_vm0, %v629_v49  ;;  %3710 = vmatpush3.bf16.msra.mxu1 %v4076_v29 }
  0xd7   : > { %3711 = vmatprep.subr.bf16.mxu1 %v4077_v30 }
  0xda   : > { %3712 = vmatpush3.bf16.msra.mxu1 %v4077_v30 }
  0xdd   : > { %1381 = vmatmul.mubr.bf16.gmra.mrb[8].mxu1 %v628_v54 }
  0xde   : > { %3422 = vmatprep.mubr.msk.bf16.mxu1 %vm1190_vm0, %v633_v55 }
  0xe5   : > { %1391 = vmatmul.mubr.bf16.gmra.mrb[12].mxu1 %v632_v60 }
  0xe6   : > { %3423 = vmatprep.mubr.msk.bf16.mxu1 %vm1190_vm0, %v637_v61 }
  0xed   : > { %1401 = vmatmul.mubr.bf16.gmra.mrb[16].mxu1 %v636_v2  ;;  %v5818_v2 = vlaneseq }
  0xee   : > { %3424 = vmatprep.mubr.msk.bf16.mxu1 %vm1190_vm0, %v641_v3 }
  0xef   : > { %v5027_v13 = vshrl.u32 %v5818_v2, 7 }
  0xf1   : > { %v882_v24 = vsub.s32 0, %v5027_v13 }
  0xf5   : > { %1411 = vmatmul.mubr.bf16.gmra.mrb[20].mxu1 %v640_v8 }
  0xf6   : > { %3425 = vmatprep.mubr.msk.bf16.mxu1 %vm1190_vm0, %v645_v9 }
  0xfd   : > { %1421 = vmatmul.mubr.bf16.gmra.mrb[24].mxu1 %v644_v14 }
  0xfe   : > { %3426 = vmatprep.mubr.msk.bf16.mxu1 %vm1190_vm0, %v649_v15 }
 0x105   : > { %1431 = vmatmul.mubr.bf16.gmra.mrb[28].mxu1 %v648_v18 }
 0x15c   : > { %v3691_v32 = vpop.f32.mrb[0].mxu0 }
 0x15d   : > { %v4980_v33 = vadd.f32 %v3691_v32, %v4977_v31  ;;  %v755_v34 = vpop.f32.mrb[1].mxu0 }
 0x15e   : > { %v4983_v35 = vadd.f32 %v4977_v31, %v755_v34  ;;  %v3692_v36 = vpop.f32.mrb[2].mxu0  ;;  %v878_v34 = vld [vmem:[%s5804_s6] sm:$0x3] }
 0x15f   : > { %v3429_v38 = vmul.f32 -1.442695, %v4980_v33  ;;  %v4987_v39 = vadd.f32 %v3692_v36, %v4977_v31  ;;  %v758_v40 = vpop.f32.mrb[3].mxu0  ;;  %v886_v36 = vsub.s32 1, %v5027_v13 }
 0x160   : > { %v3427_v41 = vmul.f32 -1.442695, %v4983_v35  ;;  %v4991_v42 = vadd.f32 %v4977_v31, %v758_v40 }
 0x161   : > { %4087 = vpow2.f32 %v3429_v38  ;;  %v3430_v43 = vmul.f32 -1.442695, %v4987_v39 }
 0x162   : > { %4089 = vpow2.f32 %v3427_v41  ;;  %v3428_v44 = vmul.f32 -1.442695, %v4991_v42 }
 0x163   : > { %4091 = vpow2.f32 %v3430_v43 }
 0x164   : > { %4093 = vpow2.f32 %v3428_v44  ;;  %v3695_v45 = vpop.f32.mrb[4].mxu0 }
 0x165   : > { %v4996_v46 = vadd.f32 %v3695_v45, %v4977_v31  ;;  %v771_v47 = vpop.f32.mrb[5].mxu0 }
 0x166   : > { %v4999_v48 = vadd.f32 %v4977_v31, %v771_v47  ;;  %v3696_v49 = vpop.f32.mrb[6].mxu0 }
 0x167   : > { %v3433_v50 = vmul.f32 -1.442695, %v4996_v46  ;;  %v5003_v51 = vadd.f32 %v3696_v49, %v4977_v31  ;;  %v774_v52 = vpop.f32.mrb[7].mxu0 }
 0x168   : > { %v3431_v53 = vmul.f32 -1.442695, %v4999_v48  ;;  %v5007_v54 = vadd.f32 %v4977_v31, %v774_v52  ;;  %v5053_v52 = vrot.slane %v878_v34, %v882_v24 }
 0x169   : > { %4095 = vpow2.f32 %v3433_v50  ;;  %v3434_v55 = vmul.f32 -1.442695, %v5003_v51 }
 0x16a   : > { %4097 = vpow2.f32 %v3431_v53  ;;  %v3432_v56 = vmul.f32 -1.442695, %v5007_v54 }
 0x16b   : > { %v4088_v57 = vpop.eup %4087  ;;  %4099 = vpow2.f32 %v3434_v55  ;;  %v5056_v55 = vrot.slane %v878_v34, %v886_v36 }
 0x16c   : > { %v4090_v58 = vpop.eup %4089  ;;  %v1491_v59 = vadd.f32 1.0, %v4088_v57  ;;  %4101 = vpow2.f32 %v3432_v56 }
 0x16d   : > { %v4092_v61 = vpop.eup %4091  ;;  %v1489_v62 = vadd.f32 1.0, %v4090_v58 }
 0x16e   : > { %v4094_v1 = vpop.eup %4093  ;;  %4103 = vrcp.f32 %v1491_v59  ;;  %v1492_v3 = vadd.f32 1.0, %v4092_v61 }
 0x16f   : > { %4105 = vrcp.f32 %v1489_v62  ;;  %v1490_v6 = vadd.f32 1.0, %v4094_v1  ;;  %v2007_v62 = vld [vmem:[%s5806_s8 + $0x10] sm:$0xff] }
 0x170   : > { %4107 = vrcp.f32 %v1492_v3 }
 0x171   : > { %4109 = vrcp.f32 %v1490_v6 }
 0x173   : > { %v3699_v60 = vpop.f32.mrb[8].mxu0  ;;  %v4096_v15 = vpop.eup %4095 }
 0x174   : > { %v5012_v63 = vadd.f32 %v3699_v60, %v4977_v31  ;;  %v787_v0 = vpop.f32.mrb[9].mxu0  ;;  %v4098_v16 = vpop.eup %4097  ;;  %v1495_v17 = vadd.f32 1.0, %v4096_v15 }
 0x175   : > { %v5015_v4 = vadd.f32 %v4977_v31, %v787_v0  ;;  %v3700_v5 = vpop.f32.mrb[10].mxu0  ;;  %v4100_v19 = vpop.eup %4099  ;;  %v1493_v20 = vadd.f32 1.0, %v4098_v16 }
 0x176   : > { %v3437_v7 = vmul.f32 -1.442695, %v5012_v63  ;;  %v5019_v8 = vadd.f32 %v3700_v5, %v4977_v31  ;;  %v790_v9 = vpop.f32.mrb[11].mxu0  ;;  %v4102_v23 = vpop.eup %4101  ;;  %v1496_v25 = vadd.f32 1.0, %v4100_v19 }
 0x177   : > { %v3435_v10 = vmul.f32 -1.442695, %v5015_v4  ;;  %v5023_v11 = vadd.f32 %v4977_v31, %v790_v9  ;;  %v1494_v27 = vadd.f32 1.0, %v4102_v23 }
 0x178   : > { %v3438_v12 = vmul.f32 -1.442695, %v5019_v8  ;;  %4111 = vpow2.f32 %v3437_v7  ;;  %v4104_v32 = vpop.eup %4103 }
 0x179   : > { %v3436_v14 = vmul.f32 -1.442695, %v5023_v11  ;;  %4113 = vpow2.f32 %v3435_v10  ;;  %v4106_v41 = vpop.eup %4105  ;;  %v1539_v43 = vmul.f32 %v4104_v32, %v4980_v33 }
 0x17a   : > { %4115 = vpow2.f32 %v3438_v12  ;;  %v4108_v45 = vpop.eup %4107  ;;  %v1537_v47 = vmul.f32 %v4106_v41, %v4983_v35 }
 0x17b   : > { %v3703_v18 = vpop.f32.mrb[12].mxu0  ;;  %4117 = vpow2.f32 %v3436_v14  ;;  %v4110_v50 = vpop.eup %4109  ;;  %v1540_v53 = vmul.f32 %v4108_v45, %v4987_v39  ;;  %v2005_v39 = vld [vmem:[%s5806_s8] sm:$0xff] }
 0x17c   : > { %v5031_v21 = vadd.f32 %v3703_v18, %v4977_v31  ;;  %v803_v22 = vpop.f32.mrb[13].mxu0  ;;  %4119 = vrcp.f32 %v1495_v17  ;;  %v1538_v33 = vmul.f32 %v4110_v50, %v4991_v42  ;;  %v3814_v15 = vpack.c.bf16 %v2007_v62, %v2005_v39 }
 0x17d   : > { %v5035_v26 = vadd.f32 %v4977_v31, %v803_v22  ;;  %v3704_v37 = vpop.f32.mrb[14].mxu0  ;;  %4121 = vrcp.f32 %v1493_v20  ;;  %v2528_v57 = vpack.c.bf16 %v1540_v53, %v1539_v43 }
 0x17e   : > { %v3441_v28 = vmul.f32 -1.442695, %v5031_v21  ;;  %v5039_v29 = vadd.f32 %v3704_v37, %v4977_v31  ;;  %v806_v30 = vpop.f32.mrb[15].mxu0  ;;  %4123 = vrcp.f32 %v1496_v25  ;;  %v2527_v60 = vpack.c.bf16 %v1538_v33, %v1537_v47 }
 0x17f   : > { %v3439_v38 = vmul.f32 -1.442695, %v5035_v26  ;;  %v5047_v40 = vadd.f32 %v4977_v31, %v806_v30  ;;  %4125 = vrcp.f32 %v1494_v27 }
 0x180   : > { %v3442_v44 = vmul.f32 -1.442695, %v5039_v29  ;;  %4127 = vpow2.f32 %v3441_v28  ;;  %3713 = vmatprep.mubr.msk.bf16.mxu1 %vm2574_vm1, %v2527_v60 }
 0x181   : > { %v3440_v49 = vmul.f32 -1.442695, %v5047_v40  ;;  %4129 = vpow2.f32 %v3439_v38  ;;  %3714 = vmatmul.mubr.msk.bf16.vlgmr.msra.gmra.mrb[32].mxu1 %vm2574_vm1, %v2528_v57 }
 0x182   : > { %v4112_v31 = vpop.eup %4111  ;;  %4131 = vpow2.f32 %v3442_v44 }
 0x183   : > { %v4114_v56 = vpop.eup %4113  ;;  %v1499_v58 = vadd.f32 1.0, %v4112_v31  ;;  %4133 = vpow2.f32 %v3440_v49 }
 0x184   : > { %v4116_v35 = vpop.eup %4115  ;;  %v1497_v61 = vadd.f32 1.0, %v4114_v56 }
 0x185   : > { %v4118_v0 = vpop.eup %4117  ;;  %4135 = vrcp.f32 %v1499_v58  ;;  %v1500_v3 = vadd.f32 1.0, %v4116_v35 }
 0x186   : > { %v4120_v5 = vpop.eup %4119  ;;  %4137 = vrcp.f32 %v1497_v61  ;;  %v1498_v9 = vadd.f32 1.0, %v4118_v0 }
 0x187   : > { %v4122_v10 = vpop.eup %4121  ;;  %v1543_v14 = vmul.f32 %v4120_v5, %v4996_v46  ;;  %4139 = vrcp.f32 %v1500_v3 }
 0x188   : > { %v4124_v16 = vpop.eup %4123  ;;  %v1541_v19 = vmul.f32 %v4122_v10, %v4999_v48  ;;  %4141 = vrcp.f32 %v1498_v9 }
 0x189   : > { %v4126_v20 = vpop.eup %4125  ;;  %v1544_v46 = vmul.f32 %v4124_v16, %v5003_v51 }
 0x18a   : > { %v4128_v24 = vpop.eup %4127  ;;  %v1542_v37 = vmul.f32 %v4126_v20, %v5007_v54 }
 0x18b   : > { %v4130_v48 = vpop.eup %4129  ;;  %v2530_v27 = vpack.c.bf16 %v1544_v46, %v1543_v14  ;;  %v1503_v28 = vadd.f32 1.0, %v4128_v24 }
 0x18c   : > { %v4132_v30 = vpop.eup %4131  ;;  %v2529_v34 = vpack.c.bf16 %v1542_v37, %v1541_v19  ;;  %v1501_v36 = vadd.f32 1.0, %v4130_v48 }
 0x18d   : > { %v4134_v51 = vpop.eup %4133  ;;  %v1504_v43 = vadd.f32 1.0, %v4132_v30  ;;  %4143 = vrcp.f32 %v1503_v28 }
 0x18e   : > { %v1502_v47 = vadd.f32 1.0, %v4134_v51  ;;  %3717 = vmatprep.mubr.msk.bf16.mxu1 %vm2574_vm1, %v2529_v34  ;;  %4145 = vrcp.f32 %v1501_v36 }
 0x18f   : > { %v4136_v49 = vpop.eup %4135  ;;  %3718 = vmatmul.mubr.msk.bf16.gmra.mrb[36].mxu1 %vm2574_vm1, %v2530_v27  ;;  %4147 = vrcp.f32 %v1504_v43 }
 0x190   : > { %v4138_v53 = vpop.eup %4137  ;;  %v1547_v58 = vmul.f32 %v4136_v49, %v5012_v63  ;;  %4149 = vrcp.f32 %v1502_v47 }
 0x191   : > { %v4140_v35 = vpop.eup %4139  ;;  %v1545_v60 = vmul.f32 %v4138_v53, %v5015_v4 }
 0x192   : > { %v1548_v61 = vmul.f32 %v4140_v35, %v5019_v8  ;;  %v4142_v39 = vpop.eup %4141 }
 0x193   : > { %v1546_v5 = vmul.f32 %v4142_v39, %v5023_v11 }
 0x194   : > { %v2532_v3 = vpack.c.bf16 %v1548_v61, %v1547_v58 }
 0x195   : > { %v2531_v8 = vpack.c.bf16 %v1546_v5, %v1545_v60 }
 0x197   : > { %v4144_v10 = vpop.eup %4143  ;;  %3721 = vmatprep.mubr.msk.bf16.mxu1 %vm2574_vm1, %v2531_v8 }
 0x198   : > { %3722 = vmatmul.mubr.msk.bf16.gmra.mrb[40].mxu1 %vm2574_vm1, %v2532_v3 }
 0x1a0   : > { %v1362_v59 = vpop.f32.mrb[0].mxu1 }
 0x1a1   : > { %v5066_v42 = vadd.f32 %v1362_v59, %v5053_v52  ;;  %v1364_v1 = vpop.f32.mrb[1].mxu1 }
 0x1a2   : > { %v5069_v6 = vadd.f32 %v1364_v1, %v5056_v55  ;;  %v1366_v7 = vpop.f32.mrb[2].mxu1 }
 0x1a3   : > { %v1368_v12 = vpop.f32.mrb[3].mxu1  ;;  %v1553_v22 = vmul.f32 %v5066_v42, %v5066_v42  ;;  %v5083_v23 = vadd.f32 %v1366_v7, %v5053_v52 }
 0x1a4   : > { %v1554_v17 = vmul.f32 %v5069_v6, %v5069_v6  ;;  %v5077_v18 = vadd.f32 %v1368_v12, %v5056_v55 }
 0x1a5   : > { %v1555_v54 = vmul.f32 %v5083_v23, %v5083_v23 }
 0x1a6   : > { %v1556_v25 = vmul.f32 %v5077_v18, %v5077_v18  ;;  %3443 = vmatprep.mubr.msk.f32.mxu0 %vm1603_vm2, %v1554_v17  ;;  %v1551_v17 = vmul.f32 %v4144_v10, %v5031_v21 }
 0x1a7   : > { %1717 = vmatmul.mubr.f32.vlgmr.msra.gmra.mrb[16].mxu0 %v1553_v22 }
 0x1a8   : > { %v1372_v32 = vpop.f32.mrb[4].mxu1  ;;  %3444 = vmatprep.mubr.msk.f32.mxu0 %vm1603_vm2, %v1556_v25  ;;  %3815 = vmatpush1.bf16.msra.mxu0 %v3814_v15  ;;  %v4146_v15 = vpop.eup %4145 }
 0x1a9   : > { %v5092_v38 = vadd.f32 %v1372_v32, %v5053_v52  ;;  %v1374_v41 = vpop.f32.mrb[5].mxu1  ;;  %v4148_v19 = vpop.eup %4147  ;;  %v1549_v22 = vmul.f32 %v4146_v15, %v5035_v26 }
 0x1aa   : > { %v5097_v44 = vadd.f32 %v1374_v41, %v5056_v55  ;;  %v1376_v45 = vpop.f32.mrb[6].mxu1  ;;  %v1552_v46 = vmul.f32 %v4148_v19, %v5039_v29  ;;  %v4150_v24 = vpop.eup %4149 }
 0x1ab   : > { %v1378_v50 = vpop.f32.mrb[7].mxu1  ;;  %1722 = vmatmul.mubr.f32.gmra.mrb[18].mxu0 %v1555_v54  ;;  %v5107_v56 = vadd.f32 %v1376_v45, %v5053_v52  ;;  %v1557_v57 = vmul.f32 %v5092_v38, %v5092_v38  ;;  %v1550_v28 = vmul.f32 %v4150_v24, %v5047_v40 }
 0x1ac   : > { %v1558_v31 = vmul.f32 %v5097_v44, %v5097_v44  ;;  %v5104_v33 = vadd.f32 %v1378_v50, %v5056_v55  ;;  %v2534_v27 = vpack.c.bf16 %v1552_v46, %v1551_v17 }
 0x1ad   : > { %v1559_v1 = vmul.f32 %v5107_v56, %v5107_v56  ;;  %v2533_v29 = vpack.c.bf16 %v1550_v28, %v1549_v22 }
 0x1ae   : > { %v1560_v59 = vmul.f32 %v5104_v33, %v5104_v33  ;;  %3445 = vmatprep.mubr.msk.f32.mxu0 %vm1603_vm2, %v1558_v31 }
 0x1af   : > { %1727 = vmatmul.mubr.f32.gmra.mrb[20].mxu0 %v1557_v57  ;;  %3725 = vmatprep.mubr.msk.bf16.mxu1 %vm2574_vm1, %v2533_v29 }
 0x1b0   : > { %v1382_v62 = vpop.f32.mrb[8].mxu1  ;;  %3446 = vmatprep.mubr.msk.f32.mxu0 %vm1603_vm2, %v1560_v59  ;;  %3726 = vmatmul.mubr.msk.bf16.gmra.mrb[44].mxu1 %vm2574_vm1, %v2534_v27 }
 0x1b1   : > { %v5119_v0 = vadd.f32 %v1382_v62, %v5053_v52  ;;  %v1384_v63 = vpop.f32.mrb[9].mxu1 }
 0x1b2   : > { %v5125_v7 = vadd.f32 %v1384_v63, %v5056_v55  ;;  %v1386_v4 = vpop.f32.mrb[10].mxu1 }
 0x1b3   : > { %v1388_v9 = vpop.f32.mrb[11].mxu1  ;;  %1732 = vmatmul.mubr.f32.gmra.mrb[22].mxu0 %v1559_v1  ;;  %v5133_v16 = vadd.f32 %v1386_v4, %v5053_v52  ;;  %v1561_v11 = vmul.f32 %v5119_v0, %v5119_v0 }
 0x1b4   : > { %v1562_v12 = vmul.f32 %v5125_v7, %v5125_v7  ;;  %v5130_v14 = vadd.f32 %v1388_v9, %v5056_v55 }
 0x1b5   : > { %v1563_v48 = vmul.f32 %v5133_v16, %v5133_v16 }
 0x1b6   : > { %v1564_v20 = vmul.f32 %v5130_v14, %v5130_v14  ;;  %3447 = vmatprep.mubr.msk.f32.mxu0 %vm1603_vm2, %v1562_v12 }
 0x1b7   : > { %1737 = vmatmul.mubr.f32.gmra.mrb[24].mxu0 %v1561_v11 }
 0x1b8   : > { %v1392_v25 = vpop.f32.mrb[12].mxu1  ;;  %3448 = vmatprep.mubr.msk.f32.mxu0 %vm1603_vm2, %v1564_v20 }
 0x1b9   : > { %v5147_v21 = vadd.f32 %v1392_v25, %v5053_v52  ;;  %v1394_v37 = vpop.f32.mrb[13].mxu1 }
 0x1ba   : > { %v5153_v30 = vadd.f32 %v1394_v37, %v5056_v55  ;;  %v1396_v26 = vpop.f32.mrb[14].mxu1 }
 0x1bb   : > { %v1398_v32 = vpop.f32.mrb[15].mxu1  ;;  %1742 = vmatmul.mubr.f32.gmra.mrb[26].mxu0 %v1563_v48  ;;  %v5161_v51 = vadd.f32 %v1396_v26, %v5053_v52  ;;  %v1565_v41 = vmul.f32 %v5147_v21, %v5147_v21 }
 0x1bc   : > { %v1566_v34 = vmul.f32 %v5153_v30, %v5153_v30  ;;  %v5158_v36 = vadd.f32 %v1398_v32, %v5056_v55 }
 0x1bd   : > { %v1567_v47 = vmul.f32 %v5161_v51, %v5161_v51 }
 0x1be   : > { %v1568_v40 = vmul.f32 %v5158_v36, %v5158_v36  ;;  %3449 = vmatprep.mubr.msk.f32.mxu0 %vm1603_vm2, %v1566_v34 }
 0x1bf   : > { %1747 = vmatmul.mubr.f32.gmra.mrb[28].mxu0 %v1565_v41 }
 0x1c0   : > { %v1402_v54 = vpop.f32.mrb[16].mxu1  ;;  %3450 = vmatprep.mubr.msk.f32.mxu0 %vm1603_vm2, %v1568_v40 }
 0x1c1   : > { %v5172_v43 = vadd.f32 %v1402_v54, %v5053_v52  ;;  %v1404_v45 = vpop.f32.mrb[17].mxu1 }
 0x1c2   : > { %v5177_v49 = vadd.f32 %v1404_v45, %v5056_v55  ;;  %v1406_v50 = vpop.f32.mrb[18].mxu1 }
 0x1c3   : > { %v1408_v53 = vpop.f32.mrb[19].mxu1  ;;  %1752 = vmatmul.mubr.f32.gmra.mrb[30].mxu0 %v1567_v47  ;;  %v5185_v58 = vadd.f32 %v1406_v50, %v5053_v52  ;;  %v1569_v35 = vmul.f32 %v5172_v43, %v5172_v43 }
 0x1c4   : > { %v1570_v31 = vmul.f32 %v5177_v49, %v5177_v49  ;;  %v5182_v57 = vadd.f32 %v1408_v53, %v5056_v55 }
 0x1c5   : > { %v1571_v62 = vmul.f32 %v5185_v58, %v5185_v58 }
 0x1c6   : > { %v1572_v59 = vmul.f32 %v5182_v57, %v5182_v57  ;;  %3451 = vmatprep.mubr.msk.f32.mxu0 %vm1603_vm2, %v1570_v31 }
 0x1c7   : > { %1757 = vmatmul.mubr.f32.gmra.mrb[32].mxu0 %v1569_v35 }
 0x1c8   : > { %v1412_v60 = vpop.f32.mrb[20].mxu1  ;;  %3452 = vmatprep.mubr.msk.f32.mxu0 %vm1603_vm2, %v1572_v59 }
 0x1c9   : > { %v5194_v61 = vadd.f32 %v1412_v60, %v5053_v52  ;;  %v1414_v39 = vpop.f32.mrb[21].mxu1 }
 0x1ca   : > { %v5199_v63 = vadd.f32 %v1414_v39, %v5056_v55  ;;  %v1416_v1 = vpop.f32.mrb[22].mxu1 }
 0x1cb   : > { %v1418_v3 = vpop.f32.mrb[23].mxu1  ;;  %1762 = vmatmul.mubr.f32.gmra.mrb[34].mxu0 %v1571_v62  ;;  %v5207_v9 = vadd.f32 %v1416_v1, %v5053_v52  ;;  %v1573_v8 = vmul.f32 %v5194_v61, %v5194_v61 }
 0x1cc   : > { %v1574_v5 = vmul.f32 %v5199_v63, %v5199_v63  ;;  %v5204_v4 = vadd.f32 %v1418_v3, %v5056_v55 }
 0x1cd   : > { %v1575_v17 = vmul.f32 %v5207_v9, %v5207_v9 }
 0x1ce   : > { %v1576_v10 = vmul.f32 %v5204_v4, %v5204_v4  ;;  %3453 = vmatprep.mubr.msk.f32.mxu0 %vm1603_vm2, %v1574_v5 }
 0x1cf   : > { %1767 = vmatmul.mubr.f32.gmra.mrb[36].mxu0 %v1573_v8 }
 0x1d0   : > { %v1422_v12 = vpop.f32.mrb[24].mxu1  ;;  %3454 = vmatprep.mubr.msk.f32.mxu0 %vm1603_vm2, %v1576_v10 }
 0x1d1   : > { %v5216_v15 = vadd.f32 %v1422_v12, %v5053_v52  ;;  %v1424_v11 = vpop.f32.mrb[25].mxu1 }
 0x1d2   : > { %v5221_v19 = vadd.f32 %v1424_v11, %v5056_v55  ;;  %v1426_v20 = vpop.f32.mrb[26].mxu1 }
 0x1d3   : > { %v1428_v22 = vpop.f32.mrb[27].mxu1  ;;  %1772 = vmatmul.mubr.f32.gmra.mrb[38].mxu0 %v1575_v17  ;;  %v5229_v25 = vadd.f32 %v1426_v20, %v5053_v52  ;;  %v1577_v37 = vmul.f32 %v5216_v15, %v5216_v15 }
 0x1d4   : > { %v1578_v46 = vmul.f32 %v5221_v19, %v5221_v19  ;;  %v5226_v24 = vadd.f32 %v1428_v22, %v5056_v55 }
 0x1d5   : > { %v1579_v32 = vmul.f32 %v5229_v25, %v5229_v25 }
 0x1d6   : > { %v1580_v48 = vmul.f32 %v5226_v24, %v5226_v24  ;;  %3455 = vmatprep.mubr.msk.f32.mxu0 %vm1603_vm2, %v1578_v46 }
 0x1d7   : > { %1777 = vmatmul.mubr.f32.gmra.mrb[40].mxu0 %v1577_v37 }
 0x1d8   : > { %v1432_v27 = vpop.f32.mrb[28].mxu1  ;;  %3456 = vmatprep.mubr.msk.f32.mxu0 %vm1603_vm2, %v1580_v48 }
 0x1d9   : > { %v5238_v28 = vadd.f32 %v1432_v27, %v5053_v52  ;;  %v1434_v26 = vpop.f32.mrb[29].mxu1 }
 0x1da   : > { %v5243_v29 = vadd.f32 %v1434_v26, %v5056_v55  ;;  %v1436_v34 = vpop.f32.mrb[30].mxu1 }
 0x1db   : > { %v1438_v41 = vpop.f32.mrb[31].mxu1  ;;  %1782 = vmatmul.mubr.f32.gmra.mrb[42].mxu0 %v1579_v32  ;;  %v5251_v45 = vadd.f32 %v1436_v34, %v5053_v52  ;;  %v1581_v47 = vmul.f32 %v5238_v28, %v5238_v28  ;;  %v5819_v52 = vmov 0  }
 0x1dc   : > { %v1582_v40 = vmul.f32 %v5243_v29, %v5243_v29  ;;  %v5248_v54 = vadd.f32 %v1438_v41, %v5056_v55  ;;  %v5821_v55 = vmov 0.0   ;;  %2799 = vmatprep.subr.bf16.mxu0 %v5819_v52 }
 0x1dd   : > { %v1583_v53 = vmul.f32 %v5251_v45, %v5251_v45 }
 0x1de   : > { %v1584_v50 = vmul.f32 %v5248_v54, %v5248_v54  ;;  %3457 = vmatprep.mubr.msk.f32.mxu0 %vm1603_vm2, %v1582_v40 }
 0x1df   : > { %1787 = vmatmul.mubr.f32.gmra.mrb[44].mxu0 %v1581_v47 }
 0x1e0   : > { %3458 = vmatprep.mubr.msk.f32.mxu0 %vm1603_vm2, %v1584_v50 }
 0x1e3   : > { %1792 = vmatmul.mubr.f32.gmra.mrb[46].mxu0 %v1583_v53 }
 0x1e4   : > { %2121 = vmatprep.mubr.f32.mxu0 %v5821_v55 }
 0x254   : > { %v5263_v31 = vpop.f32.mrb[32].mxu1 }
 0x255   : > { %v5265_v35 = vpop.f32.mrb[33].mxu1 }
 0x256   : > { %v5267_v59 = vpop.f32.mrb[34].mxu1 }
 0x257   : > { %v5269_v60 = vpop.f32.mrb[35].mxu1 }
 0x262   : > { %v5271_v5 = vpop.f32.mrb[36].mxu1 }
 0x263   : > { %v5273_v12 = vpop.f32.mrb[37].mxu1 }
 0x264   : > { %v5275_v11 = vpop.f32.mrb[38].mxu1 }
 0x265   : > { %v5277_v17 = vpop.f32.mrb[39].mxu1 }
 0x26b   : > { %v5279_v41 = vpop.f32.mrb[40].mxu1 }
 0x26c   : > { %5832 = vst [vmem:[#allocation13_spill] sm:$0xff] %v5279_v41  ;;  %v5281_v50 = vpop.f32.mrb[41].mxu1 }
 0x27a   : > { %v1718_v39 = vpop.f32.mrb[16].mxu0 }
 0x27b   : > { %v1719_v62 = vadd.f32 1e-12, %v1718_v39  ;;  %v1720_v1 = vpop.f32.mrb[17].mxu0 }
 0x27d   : > { %4151 = vrsqrt.f32 %v1719_v62  ;;  %vm1799_vm3 = vcmp.eq.f32.partialorder %v1719_v62, inf  ;;  %v1802_v34 = vand.u32 2147483648, %v1719_v62  ;;  %vm1801_vm4 = vcmp.eq.f32.partialorder %v1719_v62, 0.0 }
 0x27e   : > { %v1723_v3 = vpop.f32.mrb[18].mxu0 }
 0x27f   : > { %v1724_v8 = vadd.f32 1e-12, %v1723_v3  ;;  %v1725_v10 = vpop.f32.mrb[19].mxu0 }
 0x280   : > { %v5283_v10 = vpop.f32.mrb[42].mxu1 }
 0x281   : > { %4153 = vrsqrt.f32 %v1724_v8  ;;  %5833 = vst [vmem:[#allocation14_spill] sm:$0xff] %v5283_v10  ;;  %vm1806_vm5 = vcmp.eq.f32.partialorder %v1724_v8, inf  ;;  %vm1808_vm6 = vcmp.eq.f32.partialorder %v1724_v8, 0.0 }
 0x282   : > { %v1728_v20 = vpop.f32.mrb[20].mxu0 }
 0x283   : > { %v1729_v22 = vadd.f32 1e-12, %v1728_v20  ;;  %v1730_v46 = vpop.f32.mrb[21].mxu0 }
 0x285   : > { %4155 = vrsqrt.f32 %v1729_v22  ;;  %vm1813_vm7 = vcmp.eq.f32.partialorder %v1729_v22, inf  ;;  %vm1815_vm8 = vcmp.eq.f32.partialorder %v1729_v22, 0.0 }
 0x286   : > { %v1733_v37 = vpop.f32.mrb[22].mxu0 }
 0x287   : > { %v4152_v48 = vpop.eup %4151  ;;  %v1734_v27 = vadd.f32 1e-12, %v1733_v37  ;;  %v1735_v26 = vpop.f32.mrb[23].mxu0 }
 0x288   : > { %v1798_v32 = vmul.f32 %v4152_v48, %v1719_v62  ;;  %v5285_v37 = vpop.f32.mrb[43].mxu1  ;;  %v1809_v48 = vand.u32 2147483648, %v1724_v8 }
 0x289   : > { %4157 = vrsqrt.f32 %v1734_v27  ;;  %5834 = vst [vmem:[#allocation15_spill] sm:$0xff] %v5285_v37  ;;  %vm1820_vm9 = vcmp.eq.f32.partialorder %v1734_v27, inf  ;;  %v1823_v10 = vand.u32 2147483648, %v1734_v27  ;;  %vm1822_vm10 = vcmp.eq.f32.partialorder %v1734_v27, 0.0 }
 0x28a   : > { %v1800_v40 = vsel %vm1799_vm3, %v1719_v62, %v1798_v32  ;;  %v1738_v47 = vpop.f32.mrb[24].mxu0 }
 0x28b   : > { %v4154_v53 = vpop.eup %4153  ;;  %v1803_v39 = vsel %vm1801_vm4, %v1802_v34, %v1800_v40  ;;  %v1739_v1 = vadd.f32 1e-12, %v1738_v47  ;;  %v1740_v3 = vpop.f32.mrb[25].mxu0 }
 0x28c   : > { %v3459_v20 = vmul.f32 -1.442695, %v1803_v39  ;;  %v1805_v46 = vmul.f32 %v4154_v53, %v1724_v8  ;;  %v1816_v3 = vand.u32 2147483648, %v1729_v22  ;;  %v5290_v53 = vpop.f32.mrb[44].mxu1 }
 0x28d   : > { %4159 = vrsqrt.f32 %v1739_v1  ;;  %5835 = vst [vmem:[#allocation16_spill] sm:$0xff] %v5290_v53  ;;  %vm1827_vm11 = vcmp.eq.f32.partialorder %v1739_v1, inf  ;;  %vm1829_vm12 = vcmp.eq.f32.partialorder %v1739_v1, 0.0 }
 0x28e   : > { %4161 = vpow2.f32 %v3459_v20  ;;  %v1807_v26 = vsel %vm1806_vm5, %v1724_v8, %v1805_v46  ;;  %v1743_v62 = vpop.f32.mrb[26].mxu0  ;;  %v5292_v46 = vpop.f32.mrb[45].mxu1 }
 0x28f   : > { %v4156_v32 = vpop.eup %4155  ;;  %v1810_v2 = vsel %vm1808_vm6, %v1809_v48, %v1807_v26  ;;  %v5287_v52 = vadd.f32 1e-12, %v1743_v62  ;;  %v1745_v34 = vpop.f32.mrb[27].mxu0  ;;  %5836 = vst [vmem:[#allocation17_spill] sm:$0xff] %v5292_v46 }
 0x290   : > { %v3460_v40 = vmul.f32 -1.442695, %v1810_v2  ;;  %v1812_v47 = vmul.f32 %v4156_v32, %v1729_v22  ;;  %v5296_v62 = vpop.f32.mrb[46].mxu1 }
 0x291   : > { %4163 = vrsqrt.f32 %v5287_v52  ;;  %5837 = vst [vmem:[#allocation18_spill] sm:$0xff] %v5296_v62  ;;  %v5298_v34 = vpop.f32.mrb[47].mxu1  ;;  %vm1834_vm13 = vcmp.eq.f32.partialorder %v5287_v52, inf  ;;  %vm1836_vm14 = vcmp.eq.f32.partialorder %v5287_v52, 0.0 }
 0x292   : > { %4165 = vpow2.f32 %v3460_v40  ;;  %v1814_v39 = vsel %vm1813_vm7, %v1729_v22, %v1812_v47  ;;  %v1748_v20 = vpop.f32.mrb[28].mxu0  ;;  %5838 = vst [vmem:[#allocation19_spill] sm:$0xff] %v5298_v34 }
 0x293   : > { %v4158_v8 = vpop.eup %4157  ;;  %v1817_v55 = vsel %vm1815_vm8, %v1816_v3, %v1814_v39  ;;  %v5294_v48 = vadd.f32 1e-12, %v1748_v20  ;;  %v1750_v26 = vpop.f32.mrb[29].mxu0 }
 0x294   : > { %v3461_v2 = vmul.f32 -1.442695, %v1817_v55  ;;  %v1819_v32 = vmul.f32 %v4158_v8, %v1734_v27  ;;  %v1830_v8 = vand.u32 2147483648, %v1739_v1 }
 0x295   : > { %4167 = vrsqrt.f32 %v5294_v48  ;;  %vm1841_vm15 = vcmp.eq.f32.partialorder %v5294_v48, inf  ;;  %vm1843_vm0 = vcmp.eq.f32.partialorder %v5294_v48, 0.0 }
 0x296   : > { %4169 = vpow2.f32 %v3461_v2  ;;  %v1821_v22 = vsel %vm1820_vm9, %v1734_v27, %v1819_v32  ;;  %v1753_v40 = vpop.f32.mrb[30].mxu0 }
 0x297   : > { %v4160_v47 = vpop.eup %4159  ;;  %v1824_v53 = vsel %vm1822_vm10, %v1823_v10, %v1821_v22  ;;  %v5301_v3 = vadd.f32 1e-12, %v1753_v40  ;;  %v1755_v39 = vpop.f32.mrb[31].mxu0 }
 0x298   : > { %v4162_v20 = vpop.eup %4161  ;;  %v3462_v26 = vmul.f32 -1.442695, %v1824_v53  ;;  %v1826_v62 = vmul.f32 %v4160_v47, %v1739_v1  ;;  %v1837_v39 = vand.u32 2147483648, %v5287_v52 }
 0x299   : > { %v1957_v55 = vadd.f32 1.0, %v4162_v20  ;;  %4171 = vrsqrt.f32 %v5301_v3  ;;  %vm1848_vm1 = vcmp.eq.f32.partialorder %v5301_v3, inf  ;;  %vm1850_vm3 = vcmp.eq.f32.partialorder %v5301_v3, 0.0 }
 0x29a   : > { %4173 = vpow2.f32 %v3462_v26  ;;  %v1828_v34 = vsel %vm1827_vm11, %v1739_v1, %v1826_v62  ;;  %v1758_v2 = vpop.f32.mrb[32].mxu0 }
 0x29b   : > { %v4164_v32 = vpop.eup %4163  ;;  %4175 = vrcp.f32 %v1957_v55  ;;  %v1831_v27 = vsel %vm1829_vm12, %v1830_v8, %v1828_v34  ;;  %v5304_v46 = vadd.f32 1e-12, %v1758_v2  ;;  %v1760_v10 = vpop.f32.mrb[33].mxu0 }
 0x29c   : > { %v4166_v22 = vpop.eup %4165  ;;  %v3463_v40 = vmul.f32 -1.442695, %v1831_v27  ;;  %v1833_v53 = vmul.f32 %v4164_v32, %v5287_v52  ;;  %v1844_v10 = vand.u32 2147483648, %v5294_v48 }
 0x29d   : > { %v1958_v47 = vadd.f32 1.0, %v4166_v22  ;;  %4177 = vrsqrt.f32 %v5304_v46  ;;  %vm1855_vm4 = vcmp.eq.f32.partialorder %v5304_v46, inf  ;;  %vm1857_vm5 = vcmp.eq.f32.partialorder %v5304_v46, 0.0 }
 0x29e   : > { %4179 = vpow2.f32 %v3463_v40  ;;  %v1835_v1 = vsel %vm1834_vm13, %v5287_v52, %v1833_v53  ;;  %v1763_v62 = vpop.f32.mrb[34].mxu0 }
 0x29f   : > { %v4168_v34 = vpop.eup %4167  ;;  %4181 = vrcp.f32 %v1958_v47  ;;  %v1838_v20 = vsel %vm1836_vm14, %v1837_v39, %v1835_v1  ;;  %v5312_v26 = vadd.f32 1e-12, %v1763_v62  ;;  %v1765_v55 = vpop.f32.mrb[35].mxu0  ;;  %v4078_v1 = vld [vmem:[%s5809_s11] sm:$0xff]  }
 0x2a0   : > { %v4170_v8 = vpop.eup %4169  ;;  %v3464_v2 = vmul.f32 -1.442695, %v1838_v20  ;;  %v1840_v32 = vmul.f32 %v4168_v34, %v5294_v48 }
 0x2a1   : > { %v1959_v27 = vadd.f32 1.0, %v4170_v8  ;;  %4183 = vrsqrt.f32 %v5312_v26  ;;  %vm1862_vm6 = vcmp.eq.f32.partialorder %v5312_v26, inf  ;;  %vm1864_vm7 = vcmp.eq.f32.partialorder %v5312_v26, 0.0 }
 0x2a2   : > { %4185 = vpow2.f32 %v3464_v2  ;;  %v1842_v52 = vsel %vm1841_vm15, %v5294_v48, %v1840_v32  ;;  %v1768_v22 = vpop.f32.mrb[36].mxu0  ;;  %v1851_v48 = vand.u32 2147483648, %v5301_v3 }
 0x2a3   : > { %v4172_v40 = vpop.eup %4171  ;;  %4187 = vrcp.f32 %v1959_v27  ;;  %v1845_v53 = vsel %vm1843_vm0, %v1844_v10, %v1842_v52  ;;  %v5320_v47 = vadd.f32 1e-12, %v1768_v22  ;;  %v1770_v39 = vpop.f32.mrb[37].mxu0 }
 0x2a4   : > { %v4174_v62 = vpop.eup %4173  ;;  %v3465_v34 = vmul.f32 -1.442695, %v1845_v53  ;;  %v1847_v20 = vmul.f32 %v4172_v40, %v5301_v3  ;;  %v5839_v40 = vmov 0.0   ;;  %v4079_v53 = vld [vmem:[%s5809_s11 + $0x8] sm:$0xff]  }
 0x2a5   : > { %v4176_v55 = vpop.eup %4175  ;;  %v1960_v8 = vadd.f32 1.0, %v4174_v62  ;;  %4189 = vrsqrt.f32 %v5320_v47  ;;  %vm1869_vm8 = vcmp.eq.f32.partialorder %v5320_v47, inf  ;;  %vm1871_vm9 = vcmp.eq.f32.partialorder %v5320_v47, 0.0 }
 0x2a6   : > { %4191 = vpow2.f32 %v3465_v34  ;;  %v1849_v2 = vsel %vm1848_vm1, %v5301_v3, %v1847_v20  ;;  %v1773_v32 = vpop.f32.mrb[38].mxu0  ;;  %3475 = vmatmul.mubr.msk.f32.vlgmr.msra.gmra.mrb[48].mxu0 %vm1603_vm2, %v4176_v55  ;;  %v5840_v34 = vmov 0  }
 0x2a7   : > { %v4178_v27 = vpop.eup %4177  ;;  %4193 = vrcp.f32 %v1960_v8  ;;  %v1852_v10 = vsel %vm1850_vm3, %v1851_v48, %v1849_v2  ;;  %v5332_v52 = vadd.f32 1e-12, %v1773_v32  ;;  %v1775_v22 = vpop.f32.mrb[39].mxu0  ;;  %2127 = vmatprep.mubr.f32.mxu0 %v5839_v40  ;;  %2800 = vmatpush1.bf16.msra.mxu0 %v4078_v1  ;;  %v1858_v8 = vand.u32 2147483648, %v5304_v46 }
 0x2a8   : > { %v4180_v39 = vpop.eup %4179  ;;  %v3466_v62 = vmul.f32 -1.442695, %v1852_v10  ;;  %v1854_v3 = vmul.f32 %v4178_v27, %v5304_v46  ;;  %2801 = vmatprep.subr.bf16.mxu0 %v5840_v34  ;;  %v4080_v22 = vld [vmem:[%s5809_s11 + $0x10] sm:$0xff]  }
 0x2a9   : > { %v4182_v20 = vpop.eup %4181  ;;  %v1961_v55 = vadd.f32 1.0, %v4180_v39  ;;  %4195 = vrsqrt.f32 %v5332_v52  ;;  %vm1876_vm10 = vcmp.eq.f32.partialorder %v5332_v52, inf  ;;  %vm1878_vm11 = vcmp.eq.f32.partialorder %v5332_v52, 0.0 }
 0x2aa   : > { %4197 = vpow2.f32 %v3466_v62  ;;  %v1856_v1 = vsel %vm1855_vm4, %v5304_v46, %v1854_v3  ;;  %v1778_v48 = vpop.f32.mrb[40].mxu0  ;;  %3476 = vmatmul.mubr.msk.f32.gmra.mrb[50].mxu0 %vm1603_vm2, %v4182_v20 }
 0x2ab   : > { %v4184_v2 = vpop.eup %4183  ;;  %4199 = vrcp.f32 %v1961_v55  ;;  %v1859_v32 = vsel %vm1857_vm5, %v1858_v8, %v1856_v1  ;;  %v5346_v27 = vadd.f32 1e-12, %v1778_v48  ;;  %v1780_v10 = vpop.f32.mrb[41].mxu0  ;;  %2133 = vmatprep.mubr.f32.mxu0 %v5839_v40  ;;  %2802 = vmatpush1.bf16.msra.mxu0 %v4079_v53  ;;  %v1865_v55 = vand.u32 2147483648, %v5312_v26 }
 0x2ac   : > { %v4186_v39 = vpop.eup %4185  ;;  %v3467_v62 = vmul.f32 -1.442695, %v1859_v32  ;;  %v1861_v46 = vmul.f32 %v4184_v2, %v5312_v26  ;;  %2803 = vmatprep.subr.bf16.mxu0 %v5840_v34  ;;  %v4081_v10 = vld [vmem:[%s5809_s11 + $0x18] sm:$0xff]  }
 0x2ad   : > { %v4188_v3 = vpop.eup %4187  ;;  %v1962_v20 = vadd.f32 1.0, %v4186_v39  ;;  %4201 = vrsqrt.f32 %v5346_v27  ;;  %vm1883_vm12 = vcmp.eq.f32.partialorder %v5346_v27, inf  ;;  %vm1885_vm13 = vcmp.eq.f32.partialorder %v5346_v27, 0.0 }
 0x2ae   : > { %4203 = vpow2.f32 %v3467_v62  ;;  %v1863_v53 = vsel %vm1862_vm6, %v5312_v26, %v1861_v46  ;;  %v1783_v8 = vpop.f32.mrb[42].mxu0  ;;  %3477 = vmatmul.mubr.msk.f32.gmra.mrb[52].mxu0 %vm1603_vm2, %v4188_v3 }
 0x2af   : > { %v4190_v1 = vpop.eup %4189  ;;  %4205 = vrcp.f32 %v1962_v20  ;;  %v1866_v48 = vsel %vm1864_vm7, %v1865_v55, %v1863_v53  ;;  %v5360_v2 = vadd.f32 1e-12, %v1783_v8  ;;  %v1785_v32 = vpop.f32.mrb[43].mxu0  ;;  %2139 = vmatprep.mubr.f32.mxu0 %v5839_v40  ;;  %2804 = vmatpush1.bf16.msra.mxu0 %v4080_v22  ;;  %v1872_v20 = vand.u32 2147483648, %v5320_v47 }
 0x2b0   : > { %v4192_v39 = vpop.eup %4191  ;;  %v3468_v62 = vmul.f32 -1.442695, %v1866_v48  ;;  %v1868_v26 = vmul.f32 %v4190_v1, %v5320_v47  ;;  %2805 = vmatprep.subr.bf16.mxu0 %v5840_v34  ;;  %v4082_v32 = vld [vmem:[%s5809_s11 + $0x20] sm:$0xff]  }
 0x2b1   : > { %v4194_v46 = vpop.eup %4193  ;;  %v1963_v3 = vadd.f32 1.0, %v4192_v39  ;;  %4207 = vrsqrt.f32 %v5360_v2  ;;  %vm1890_vm14 = vcmp.eq.f32.partialorder %v5360_v2, inf  ;;  %vm1892_vm15 = vcmp.eq.f32.partialorder %v5360_v2, 0.0 }
 0x2b2   : > { %4209 = vpow2.f32 %v3468_v62  ;;  %v1870_v22 = vsel %vm1869_vm8, %v5320_v47, %v1868_v26  ;;  %v1788_v55 = vpop.f32.mrb[44].mxu0  ;;  %3478 = vmatmul.mubr.msk.f32.gmra.mrb[54].mxu0 %vm1603_vm2, %v4194_v46 }
 0x2b3   : > { %v4196_v53 = vpop.eup %4195  ;;  %4211 = vrcp.f32 %v1963_v3  ;;  %v1873_v8 = vsel %vm1871_vm9, %v1872_v20, %v1870_v22  ;;  %v5374_v1 = vadd.f32 1e-12, %v1788_v55  ;;  %v1790_v48 = vpop.f32.mrb[45].mxu0  ;;  %2145 = vmatprep.mubr.f32.mxu0 %v5839_v40  ;;  %2806 = vmatpush1.bf16.msra.mxu0 %v4081_v10  ;;  %v1879_v3 = vand.u32 2147483648, %v5332_v52 }
 0x2b4   : > { %v4198_v39 = vpop.eup %4197  ;;  %v3469_v62 = vmul.f32 -1.442695, %v1873_v8  ;;  %v1875_v47 = vmul.f32 %v4196_v53, %v5332_v52  ;;  %2807 = vmatprep.subr.bf16.mxu0 %v5840_v34  ;;  %v4083_v48 = vld [vmem:[%s5809_s11 + $0x28] sm:$0xff]  }
 0x2b5   : > { %v4200_v26 = vpop.eup %4199  ;;  %v1964_v46 = vadd.f32 1.0, %v4198_v39  ;;  %4213 = vrsqrt.f32 %v5374_v1  ;;  %vm1897_vm0 = vcmp.eq.f32.partialorder %v5374_v1, inf  ;;  %vm1899_vm1 = vcmp.eq.f32.partialorder %v5374_v1, 0.0 }
 0x2b6   : > { %4215 = vpow2.f32 %v3469_v62  ;;  %v1877_v10 = vsel %vm1876_vm10, %v5332_v52, %v1875_v47  ;;  %v1793_v20 = vpop.f32.mrb[46].mxu0  ;;  %3479 = vmatmul.mubr.msk.f32.gmra.mrb[56].mxu0 %vm1603_vm2, %v4200_v26 }
 0x2b7   : > { %v4202_v22 = vpop.eup %4201  ;;  %4217 = vrcp.f32 %v1964_v46  ;;  %v1880_v55 = vsel %vm1878_vm11, %v1879_v3, %v1877_v10  ;;  %v5388_v53 = vadd.f32 1e-12, %v1793_v20  ;;  %v1795_v8 = vpop.f32.mrb[47].mxu0  ;;  %2151 = vmatprep.mubr.f32.mxu0 %v5839_v40  ;;  %2808 = vmatpush1.bf16.msra.mxu0 %v4082_v32  ;;  %v1886_v46 = vand.u32 2147483648, %v5346_v27  ;;  %v4084_v20 = vld [vmem:[%s5809_s11 + $0x30] sm:$0xff]  }
 0x2b8   : > { %v4204_v39 = vpop.eup %4203  ;;  %v3470_v62 = vmul.f32 -1.442695, %v1880_v55  ;;  %v1882_v52 = vmul.f32 %v4202_v22, %v5346_v27  ;;  %2809 = vmatprep.subr.bf16.mxu0 %v5840_v34 }
 0x2b9   : > { %v4206_v47 = vpop.eup %4205  ;;  %v1965_v26 = vadd.f32 1.0, %v4204_v39  ;;  %4219 = vrsqrt.f32 %v5388_v53  ;;  %vm1904_vm3 = vcmp.eq.f32.partialorder %v5388_v53, inf  ;;  %vm1906_vm4 = vcmp.eq.f32.partialorder %v5388_v53, 0.0 }
 0x2ba   : > { %4221 = vpow2.f32 %v3470_v62  ;;  %v1884_v32 = vsel %vm1883_vm12, %v5346_v27, %v1882_v52  ;;  %3480 = vmatmul.mubr.msk.f32.gmra.mrb[58].mxu0 %vm1603_vm2, %v4206_v47  ;;  %v1893_v62 = vand.u32 2147483648, %v5360_v2 }
 0x2bb   : > { %v4208_v3 = vpop.eup %4207  ;;  %4223 = vrcp.f32 %v1965_v26  ;;  %v1887_v10 = vsel %vm1885_vm13, %v1886_v46, %v1884_v32  ;;  %2157 = vmatprep.mubr.f32.mxu0 %v5839_v40  ;;  %2810 = vmatpush1.bf16.msra.mxu0 %v4083_v48  ;;  %v4085_v26 = vld [vmem:[%s5809_s11 + $0x38] sm:$0xff]  }
 0x2bc   : > { %v4210_v22 = vpop.eup %4209  ;;  %v3471_v55 = vmul.f32 -1.442695, %v1887_v10  ;;  %v1889_v8 = vmul.f32 %v4208_v3, %v5360_v2  ;;  %2811 = vmatprep.subr.bf16.mxu0 %v5840_v34 }
 0x2bd   : > { %v4212_v39 = vpop.eup %4211  ;;  %v1966_v27 = vadd.f32 1.0, %v4210_v22  ;;  %v1900_v22 = vand.u32 2147483648, %v5374_v1 }
 0x2be   : > { %4225 = vpow2.f32 %v3471_v55  ;;  %v1891_v52 = vsel %vm1890_vm14, %v5360_v2, %v1889_v8  ;;  %3481 = vmatmul.mubr.msk.f32.gmra.mrb[60].mxu0 %vm1603_vm2, %v4212_v39 }
 0x2bf   : > { %v4214_v48 = vpop.eup %4213  ;;  %4227 = vrcp.f32 %v1966_v27  ;;  %v1894_v47 = vsel %vm1892_vm15, %v1893_v62, %v1891_v52  ;;  %2163 = vmatprep.mubr.f32.mxu0 %v5839_v40  ;;  %2812 = vmatpush1.bf16.msra.mxu0 %v4084_v20 }
 0x2c0   : > { %v4216_v46 = vpop.eup %4215  ;;  %v3472_v32 = vmul.f32 -1.442695, %v1894_v47  ;;  %v1896_v3 = vmul.f32 %v4214_v48, %v5374_v1  ;;  %2813 = vmatprep.subr.bf16.mxu0 %v5840_v34 }
 0x2c1   : > { %v4218_v10 = vpop.eup %4217  ;;  %v1967_v2 = vadd.f32 1.0, %v4216_v46 }
 0x2c2   : > { %4229 = vpow2.f32 %v3472_v32  ;;  %v1898_v55 = vsel %vm1897_vm0, %v5374_v1, %v1896_v3  ;;  %3482 = vmatmul.mubr.msk.f32.gmra.mrb[62].mxu0 %vm1603_vm2, %v4218_v10  ;;  %v1907_v1 = vand.u32 2147483648, %v5388_v53 }
 0x2c3   : > { %v4220_v20 = vpop.eup %4219  ;;  %4231 = vrcp.f32 %v1967_v2  ;;  %v1901_v8 = vsel %vm1899_vm1, %v1900_v22, %v1898_v55  ;;  %2169 = vmatprep.mubr.f32.mxu0 %v5839_v40  ;;  %2814 = vmatpush1.bf16.msra.mxu0 %v4085_v26 }
 0x2c4   : > { %v4222_v39 = vpop.eup %4221  ;;  %v3473_v27 = vmul.f32 -1.442695, %v1901_v8  ;;  %v1903_v62 = vmul.f32 %v4220_v20, %v5388_v53  ;;  %2815 = vmatprep.subr.bf16.mxu0 %v5840_v34 }
 0x2c5   : > { %v4224_v52 = vpop.eup %4223  ;;  %v1968_v48 = vadd.f32 1.0, %v4222_v39 }
 0x2c6   : > { %4233 = vpow2.f32 %v3473_v27  ;;  %v1905_v47 = vsel %vm1904_vm3, %v5388_v53, %v1903_v62  ;;  %3483 = vmatmul.mubr.msk.f32.gmra.mrb[64].mxu0 %vm1603_vm2, %v4224_v52 }
 0x2c7   : > { %4235 = vrcp.f32 %v1968_v48  ;;  %v1908_v26 = vsel %vm1906_vm4, %v1907_v1, %v1905_v47  ;;  %2175 = vmatprep.mubr.f32.mxu0 %v5839_v40  ;;  %v4086_v1 = vld [vmem:[%s5809_s11 + $0x40] sm:$0xff]   ;;  %v2223_v47 = vand.u32 2147483647, %v5066_v42 }
 0x2c8   : > { %v4226_v46 = vpop.eup %4225  ;;  %v3474_v32 = vmul.f32 -1.442695, %v1908_v26  ;;  %2816 = vmatpush1.bf16.msra.mxu0 %v4086_v1  ;;  %v2225_v26 = vand.u32 2147483647, %v5083_v23 }
 0x2c9   : > { %v4228_v34 = vpop.eup %4227  ;;  %v1969_v3 = vadd.f32 1.0, %v4226_v46  ;;  %v3491_v46 = vmul.f32 -1.442695, %v2223_v47 }
 0x2ca   : > { %4237 = vpow2.f32 %v3474_v32  ;;  %3484 = vmatmul.mubr.msk.f32.gmra.mrb[66].mxu0 %vm1603_vm2, %v4228_v34  ;;  %v3493_v32 = vmul.f32 -1.442695, %v2225_v26  ;;  %v2227_v34 = vand.u32 2147483647, %v5092_v38 }
 0x2cb   : > { %4239 = vrcp.f32 %v1969_v3  ;;  %2181 = vmatprep.mubr.f32.mxu0 %v5839_v40 }
 0x2cc   : > { %v4230_v10 = vpop.eup %4229  ;;  %v3495_v3 = vmul.f32 -1.442695, %v2227_v34  ;;  %v5841_v34 = vlaneseq }
 0x2cd   : > { %v4232_v2 = vpop.eup %4231  ;;  %v1970_v22 = vadd.f32 1.0, %v4230_v10  ;;  %v2231_v10 = vand.u32 2147483647, %v5119_v0 }
 0x2ce   : > { %3485 = vmatmul.mubr.msk.f32.gmra.mrb[68].mxu0 %vm1603_vm2, %v4232_v2 }
 0x2cf   : > { %4241 = vrcp.f32 %v1970_v22  ;;  %2187 = vmatprep.mubr.f32.mxu0 %v5839_v40 }
 0x2d0   : > { %v4234_v53 = vpop.eup %4233 }
 0x2d1   : > { %v4236_v55 = vpop.eup %4235  ;;  %v1971_v20 = vadd.f32 1.0, %v4234_v53  ;;  %v3499_v53 = vmul.f32 -1.442695, %v2231_v10 }
 0x2d2   : > { %3486 = vmatmul.mubr.msk.f32.gmra.mrb[70].mxu0 %vm1603_vm2, %v4236_v55  ;;  %v2233_v55 = vand.u32 2147483647, %v5133_v16 }
 0x2d3   : > { %4243 = vrcp.f32 %v1971_v20  ;;  %2193 = vmatprep.mubr.f32.mxu0 %v5839_v40 }
 0x2d4   : > { %v4238_v8 = vpop.eup %4237 }
 0x2d5   : > { %v4240_v39 = vpop.eup %4239  ;;  %v1972_v27 = vadd.f32 1.0, %v4238_v8 }
 0x2d6   : > { %3487 = vmatmul.mubr.msk.f32.gmra.mrb[72].mxu0 %vm1603_vm2, %v4240_v39  ;;  %v3501_v39 = vmul.f32 -1.442695, %v2233_v55 }
 0x2d7   : > { %4245 = vrcp.f32 %v1972_v27  ;;  %2199 = vmatprep.mubr.f32.mxu0 %v5839_v40 }
 0x2d8   : > { %4247 = vpow2.f32 %v3491_v46 }
 0x2d9   : > { %v4242_v62 = vpop.eup %4241  ;;  %4249 = vpow2.f32 %v3493_v32  ;;  %v2239_v32 = vand.u32 2147483647, %v5172_v43 }
 0x2da   : > { %3488 = vmatmul.mubr.msk.f32.gmra.mrb[74].mxu0 %vm1603_vm2, %v4242_v62  ;;  %4251 = vpow2.f32 %v3495_v3  ;;  %v2235_v62 = vand.u32 2147483647, %v5147_v21 }
 0x2db   : > { %2205 = vmatprep.mubr.f32.mxu0 %v5839_v40 }
 0x2dc   : > { %v3503_v1 = vmul.f32 -1.442695, %v2235_v62 }
 0x2dd   : > { %v4244_v52 = vpop.eup %4243 }
 0x2de   : > { %3489 = vmatmul.mubr.msk.f32.gmra.mrb[76].mxu0 %vm1603_vm2, %v4244_v52 }
 0x2df   : > { %2211 = vmatprep.mubr.f32.mxu0 %v5839_v40  ;;  %v2229_v40 = vand.u32 2147483647, %v5107_v56 }
 0x2e1   : > { %v4246_v48 = vpop.eup %4245  ;;  %v3497_v2 = vmul.f32 -1.442695, %v2229_v40  ;;  %v5459_v40 = vand.u32 127, %v5841_v34 }
 0x2e2   : > { %3490 = vmatmul.mubr.msk.f32.gmra.mrb[78].mxu0 %vm1603_vm2, %v4246_v48  ;;  %v4248_v22 = vpop.eup %4247  ;;  %v2237_v48 = vand.u32 2147483647, %v5161_v51 }
 0x2e3   : > { %4253 = vpow2.f32 %v3497_v2  ;;  %v4250_v20 = vpop.eup %4249  ;;  %v2351_v8 = vadd.f32 1.0, %v4248_v22  ;;  %v2241_v2 = vand.u32 2147483647, %v5185_v58  ;;  %v3507_v22 = vmul.f32 -1.442695, %v2239_v32 }
 0x2e4   : > { %4255 = vpow2.f32 %v3499_v53  ;;  %v2353_v27 = vadd.f32 1.0, %v4250_v20  ;;  %v4252_v52 = vpop.eup %4251  ;;  %v3505_v46 = vmul.f32 -1.442695, %v2237_v48  ;;  %vm2221_vm5 = vcmp.lt.s32.totalorder %v5459_v40, 64 }
 0x2e5   : > { %4257 = vrcp.f32 %v2351_v8  ;;  %v2355_v26 = vadd.f32 1.0, %v4252_v52  ;;  %v2243_v48 = vand.u32 2147483647, %v5194_v61  ;;  %v5544_v40 = vadd.s32 8, %v5027_v13 }
 0x2e6   : > { %4259 = vpow2.f32 %v3501_v39 }
 0x2e7   : > { %4261 = vrcp.f32 %v2353_v27  ;;  %v3509_v27 = vmul.f32 -1.442695, %v2241_v2 }
 0x2e8   : > { %4263 = vpow2.f32 %v3503_v1 }
 0x2e9   : > { %4265 = vrcp.f32 %v2355_v26 }
 0x2ea   : > { %4267 = vpow2.f32 %v3505_v46 }
 0x2ed   : > { %v4254_v47 = vpop.eup %4253 }
 0x2ee   : > { %v4256_v3 = vpop.eup %4255  ;;  %v2357_v10 = vadd.f32 1.0, %v4254_v47 }
 0x2ef   : > { %v4258_v55 = vpop.eup %4257  ;;  %v2359_v20 = vadd.f32 1.0, %v4256_v3 }
 0x2f0   : > { %v4260_v39 = vpop.eup %4259  ;;  %4269 = vrcp.f32 %v2357_v10 }
 0x2f1   : > { %v4262_v52 = vpop.eup %4261  ;;  %4271 = vpow2.f32 %v3507_v22  ;;  %v2361_v47 = vadd.f32 1.0, %v4260_v39  ;;  %v3511_v22 = vmul.f32 -1.442695, %v2243_v48 }
 0x2f2   : > { %4273 = vrcp.f32 %v2359_v20  ;;  %v4264_v2 = vpop.eup %4263 }
 0x2f3   : > { %4275 = vpow2.f32 %v3509_v27  ;;  %v4266_v41 = vpop.eup %4265 }
 0x2f4   : > { %4277 = vrcp.f32 %v2361_v47 }
 0x2f5   : > { %4279 = vpow2.f32 %v3511_v22 }
 0x379   : > { %v2123_v53 = vpop.f32.mrb[48].mxu0 }
 0x37a   : > { %v2125_v8 = vpop.f32.mrb[49].mxu0  ;;  %v2447_v62 = vsel %vm2221_vm5, %v4258_v55, %v2123_v53  ;;  %v2245_v53 = vand.u32 2147483647, %v5207_v9 }
 0x37b   : > { %v2479_v32 = vmul.f32 %v5066_v42, %v2447_v62  ;;  %v2480_v34 = vmul.f32 %v5069_v6, %v2125_v8  ;;  %v2363_v42 = vadd.f32 1.0, %v4264_v2 }
 0x37d   : > { %v2129_v1 = vpop.f32.mrb[50].mxu0  ;;  %4281 = vrcp.f32 %v2363_v42 }
 0x37e   : > { %v2449_v26 = vsel %vm2221_vm5, %v4262_v52, %v2129_v1  ;;  %v2131_v46 = vpop.f32.mrb[51].mxu0  ;;  %v4268_v52 = vpop.eup %4267 }
 0x37f   : > { %v2481_v3 = vmul.f32 %v5083_v23, %v2449_v26  ;;  %v2482_v10 = vmul.f32 %v5077_v18, %v2131_v46  ;;  %v4270_v18 = vpop.eup %4269  ;;  %v3513_v23 = vmul.f32 -1.442695, %v2245_v53  ;;  %v2365_v27 = vadd.f32 1.0, %v4268_v52 }
 0x380   : > { %v4272_v1 = vpop.eup %4271 }
 0x381   : > { %v2511_v55 = vpack.c.bf16 %v2481_v3, %v2479_v32  ;;  %v2512_v20 = vpack.c.bf16 %v2482_v10, %v2480_v34  ;;  %v2135_v39 = vpop.f32.mrb[52].mxu0  ;;  %v2247_v34 = vand.u32 2147483647, %v5216_v15  ;;  %4283 = vpow2.f32 %v3513_v23 }
 0x382   : > { %v2137_v37 = vpop.f32.mrb[53].mxu0  ;;  %v2451_v6 = vsel %vm2221_vm5, %v4266_v41, %v2135_v39  ;;  %v4274_v41 = vpop.eup %4273  ;;  %v2249_v3 = vand.u32 2147483647, %v5229_v25  ;;  %4285 = vrcp.f32 %v2365_v27 }
 0x383   : > { %3546 = vmatprep.mubr.msk.bf16.mxu0 %vm1603_vm2, %v2512_v20  ;;  %v2483_v26 = vmul.f32 %v5092_v38, %v2451_v6  ;;  %v2484_v47 = vmul.f32 %v5097_v44, %v2137_v37  ;;  %v4276_v53 = vpop.eup %4275  ;;  %v3515_v38 = vmul.f32 -1.442695, %v2247_v34 }
 0x384   : > { %2832 = vmatmul.mubr.bf16.vlgmr.msra.gmra.mrb[80].mxu0 %v2511_v55  ;;  %v2367_v55 = vadd.f32 1.0, %v4272_v1  ;;  %v2369_v39 = vadd.f32 1.0, %v4276_v53 }
 0x385   : > { %v2141_v8 = vpop.f32.mrb[54].mxu0 }
 0x386   : > { %v2453_v62 = vsel %vm2221_vm5, %v4270_v18, %v2141_v8  ;;  %v2143_v48 = vpop.f32.mrb[55].mxu0  ;;  %4287 = vrcp.f32 %v2367_v55 }
 0x387   : > { %v2485_v46 = vmul.f32 %v5107_v56, %v2453_v62  ;;  %v2486_v32 = vmul.f32 %v5104_v33, %v2143_v48  ;;  %v4278_v33 = vpop.eup %4277  ;;  %v3517_v56 = vmul.f32 -1.442695, %v2249_v3  ;;  %4289 = vpow2.f32 %v3515_v38 }
 0x388   : > { %v4280_v6 = vpop.eup %4279  ;;  %v2251_v62 = vand.u32 2147483647, %v5238_v28  ;;  %v2253_v48 = vand.u32 2147483647, %v5251_v45 }
 0x389   : > { %v2514_v10 = vpack.c.bf16 %v2486_v32, %v2484_v47  ;;  %v2147_v2 = vpop.f32.mrb[56].mxu0  ;;  %v2513_v22 = vpack.c.bf16 %v2485_v46, %v2483_v26  ;;  %4291 = vpow2.f32 %v3517_v56  ;;  %v4282_v46 = vpop.eup %4281  ;;  %v2371_v32 = vadd.f32 1.0, %v4280_v6 }
 0x38a   : > { %v2149_v20 = vpop.f32.mrb[57].mxu0  ;;  %v2455_v44 = vsel %vm2221_vm5, %v4274_v41, %v2147_v2  ;;  %4293 = vrcp.f32 %v2369_v39 }
 0x38b   : > { %3547 = vmatprep.mubr.msk.bf16.mxu0 %vm1603_vm2, %v2514_v10  ;;  %v2487_v18 = vmul.f32 %v5119_v0, %v2455_v44  ;;  %v2488_v23 = vmul.f32 %v5125_v7, %v2149_v20  ;;  %v4284_v34 = vpop.eup %4283  ;;  %v3519_v0 = vmul.f32 -1.442695, %v2251_v62  ;;  %4295 = vrcp.f32 %v2371_v32 }
 0x38c   : > { %2840 = vmatmul.mubr.bf16.gmra.mrb[84].mxu0 %v2513_v22  ;;  %v2373_v10 = vadd.f32 1.0, %v4284_v34 }
 0x38d   : > { %v2153_v37 = vpop.f32.mrb[58].mxu0  ;;  %4297 = vpow2.f32 %v3519_v0 }
 0x38e   : > { %v2457_v52 = vsel %vm2221_vm5, %v4278_v33, %v2153_v37  ;;  %v2155_v42 = vpop.f32.mrb[59].mxu0 }
 0x38f   : > { %v2489_v8 = vmul.f32 %v5133_v16, %v2457_v52  ;;  %v2490_v27 = vmul.f32 %v5130_v14, %v2155_v42  ;;  %v4286_v14 = vpop.eup %4285  ;;  %v3521_v16 = vmul.f32 -1.442695, %v2253_v48 }
 0x390   : > { %v4288_v44 = vpop.eup %4287 }
 0x391   : > { %v2516_v1 = vpack.c.bf16 %v2490_v27, %v2488_v23  ;;  %v2159_v26 = vpop.f32.mrb[60].mxu0  ;;  %v2515_v47 = vpack.c.bf16 %v2489_v8, %v2487_v18  ;;  %4299 = vpow2.f32 %v3521_v16  ;;  %v4290_v39 = vpop.eup %4289 }
 0x392   : > { %v2161_v41 = vpop.f32.mrb[61].mxu0  ;;  %v2459_v7 = vsel %vm2221_vm5, %v4282_v46, %v2159_v26  ;;  %4301 = vrcp.f32 %v2373_v10 }
 0x393   : > { %3548 = vmatprep.mubr.msk.bf16.mxu0 %vm1603_vm2, %v2516_v1  ;;  %v2491_v53 = vmul.f32 %v5147_v21, %v2459_v7  ;;  %v2492_v55 = vmul.f32 %v5153_v30, %v2161_v41  ;;  %v4292_v42 = vpop.eup %4291 }
 0x394   : > { %2848 = vmatmul.mubr.bf16.gmra.mrb[88].mxu0 %v2515_v47  ;;  %v4294_v30 = vpop.eup %4293 }
 0x395   : > { %v2165_v3 = vpop.f32.mrb[62].mxu0  ;;  %v4296_v1 = vpop.eup %4295 }
 0x396   : > { %v2461_v2 = vsel %vm2221_vm5, %v4286_v14, %v2165_v3  ;;  %v2167_v22 = vpop.f32.mrb[63].mxu0 }
 0x397   : > { %v2493_v20 = vmul.f32 %v5161_v51, %v2461_v2  ;;  %v2494_v38 = vmul.f32 %v5158_v36, %v2167_v22  ;;  %v2375_v51 = vadd.f32 1.0, %v4290_v39  ;;  %v2377_v36 = vadd.f32 1.0, %v4292_v42  ;;  %v4298_v32 = vpop.eup %4297 }
 0x398   : > { %v2379_v0 = vadd.f32 1.0, %v4298_v32 }
 0x399   : > { %v2518_v33 = vpack.c.bf16 %v2494_v38, %v2492_v55  ;;  %v2171_v56 = vpop.f32.mrb[64].mxu0  ;;  %v2517_v37 = vpack.c.bf16 %v2493_v20, %v2491_v53  ;;  %4303 = vrcp.f32 %v2375_v51 }
 0x39a   : > { %v2173_v52 = vpop.f32.mrb[65].mxu0  ;;  %v2463_v21 = vsel %vm2221_vm5, %v4288_v44, %v2171_v56  ;;  %4305 = vrcp.f32 %v2377_v36 }
 0x39b   : > { %3549 = vmatprep.mubr.msk.bf16.mxu0 %vm1603_vm2, %v2518_v33  ;;  %v2495_v8 = vmul.f32 %v5172_v43, %v2463_v21  ;;  %v2496_v27 = vmul.f32 %v5177_v49, %v2173_v52  ;;  %v4300_v34 = vpop.eup %4299  ;;  %4307 = vrcp.f32 %v2379_v0 }
 0x39c   : > { %2856 = vmatmul.mubr.bf16.gmra.mrb[92].mxu0 %v2517_v37  ;;  %v4302_v49 = vpop.eup %4301  ;;  %v2381_v7 = vadd.f32 1.0, %v4300_v34 }
 0x39d   : > { %v2177_v6 = vpop.f32.mrb[66].mxu0 }
 0x39e   : > { %v2465_v18 = vsel %vm2221_vm5, %v4294_v30, %v2177_v6  ;;  %v2179_v23 = vpop.f32.mrb[67].mxu0  ;;  %4309 = vrcp.f32 %v2381_v7  ;;  %v5580_v7 = vadd.s32 16, %v5027_v13 }
 0x39f   : > { %v2497_v62 = vmul.f32 %v5185_v58, %v2465_v18  ;;  %v2498_v48 = vmul.f32 %v5182_v57, %v2179_v23 }
 0x3a1   : > { %v2520_v26 = vpack.c.bf16 %v2498_v48, %v2496_v27  ;;  %v2183_v47 = vpop.f32.mrb[68].mxu0  ;;  %v2519_v46 = vpack.c.bf16 %v2497_v62, %v2495_v8  ;;  %v5567_v48 = vld [vmem:[%s5810_s12] ss:$0 sm:$0xff] }
 0x3a2   : > { %v2185_v41 = vpop.f32.mrb[69].mxu0  ;;  %v2467_v43 = vsel %vm2221_vm5, %v4296_v1, %v2183_v47 }
 0x3a3   : > { %3550 = vmatprep.mubr.msk.bf16.mxu0 %vm1603_vm2, %v2520_v26  ;;  %v2499_v16 = vmul.f32 %v5194_v61, %v2467_v43  ;;  %v2500_v3 = vmul.f32 %v5199_v63, %v2185_v41  ;;  %v4304_v38 = vpop.eup %4303 }
 0x3a4   : > { %2864 = vmatmul.mubr.bf16.gmra.mrb[96].mxu0 %v2519_v46  ;;  %v4306_v61 = vpop.eup %4305 }
 0x3a5   : > { %v2189_v58 = vpop.f32.mrb[70].mxu0  ;;  %v4308_v51 = vpop.eup %4307 }
 0x3a6   : > { %v2469_v57 = vsel %vm2221_vm5, %v4302_v49, %v2189_v58  ;;  %v2191_v14 = vpop.f32.mrb[71].mxu0 }
 0x3a7   : > { %v2501_v10 = vmul.f32 %v5207_v9, %v2469_v57  ;;  %v2502_v2 = vmul.f32 %v5204_v4, %v2191_v14  ;;  %v5583_v57 = vadd.s32 24, %v5027_v13 }
 0x3a9   : > { %v2522_v22 = vpack.c.bf16 %v2502_v2, %v2500_v3  ;;  %v2195_v53 = vpop.f32.mrb[72].mxu0  ;;  %v2521_v55 = vpack.c.bf16 %v2501_v10, %v2499_v16 }
 0x3aa   : > { %v2197_v20 = vpop.f32.mrb[73].mxu0  ;;  %v2471_v44 = vsel %vm2221_vm5, %v4304_v38, %v2195_v53  ;;  %v5598_v38 = vadd.s32 40, %v5027_v13 }
 0x3ab   : > { %3551 = vmatprep.mubr.msk.bf16.mxu0 %vm1603_vm2, %v2522_v22  ;;  %v2503_v4 = vmul.f32 %v5216_v15, %v2471_v44  ;;  %v2504_v56 = vmul.f32 %v5221_v19, %v2197_v20  ;;  %v4310_v15 = vpop.eup %4309  ;;  %v5595_v20 = vadd.s32 32, %v5027_v13 }
 0x3ac   : > { %2872 = vmatmul.mubr.bf16.gmra.mrb[100].mxu0 %v2521_v55 }
 0x3ad   : > { %v2201_v33 = vpop.f32.mrb[74].mxu0 }
 0x3ae   : > { %v2473_v63 = vsel %vm2221_vm5, %v4306_v61, %v2201_v33  ;;  %v2203_v9 = vpop.f32.mrb[75].mxu0 }
 0x3af   : > { %v2505_v37 = vmul.f32 %v5229_v25, %v2473_v63  ;;  %v2506_v39 = vmul.f32 %v5226_v24, %v2203_v9 }
 0x3b1   : > { %v2524_v52 = vpack.c.bf16 %v2506_v39, %v2504_v56  ;;  %v2207_v42 = vpop.f32.mrb[76].mxu0  ;;  %v2523_v21 = vpack.c.bf16 %v2505_v37, %v2503_v4 }
 0x3b2   : > { %v2209_v30 = vpop.f32.mrb[77].mxu0  ;;  %v2475_v6 = vsel %vm2221_vm5, %v4308_v51, %v2207_v42 }
 0x3b3   : > { %3552 = vmatprep.mubr.msk.bf16.mxu0 %vm1603_vm2, %v2524_v52  ;;  %v2507_v24 = vmul.f32 %v5238_v28, %v2475_v6  ;;  %v2508_v18 = vmul.f32 %v5243_v29, %v2209_v30  ;;  %v5549_v28 = vld [vmem:[%s508_s13] ss:$0 sm:$0xff]  ;;  %v4413_v29 = vmov 1.0   ;;  %v5612_v6 = vadd.s32 48, %v5027_v13  ;;  %s5751_s13 = scalar_lea.hbm %s5849_s20, %s3612_s21 }
 0x3b4   : > { %2880 = vmatmul.mubr.bf16.gmra.mrb[104].mxu0 %v2523_v21  ;;  %vm3016_vm6 = vcmp.eq.s32.totalorder %v5027_v13, %v5549_v28  ;;  %vm3017_vm7 = vcmp.eq.s32.totalorder %v5544_v40, %v5549_v28 }
 0x3b5   : > { %v2213_v36 = vpop.f32.mrb[78].mxu0  ;;  %3761 = vmatprep.mubr.msk.f32.mxu1 %vm3016_vm6, %v4413_v29 }
 0x3b6   : > { %v2477_v19 = vsel %vm2221_vm5, %v4310_v15, %v2213_v36  ;;  %v2215_v25 = vpop.f32.mrb[79].mxu0 }
 0x3b7   : > { %v2509_v23 = vmul.f32 %v5251_v45, %v2477_v19  ;;  %v2510_v8 = vmul.f32 %v5248_v54, %v2215_v25  ;;  %v5557_v54 = vstv %s3554_s25  ;;  %v5562_v45 = vld [vmem:[%s5808_s10] ss:$0 sm:$0xff]  ;;  %s3226_s25 = scalar_lea.sflag [#allocation4], %s4585_s24 }
 0x3b8   : > { %v2931_v1 = vadd.s32 %v5557_v54, %v5027_v13  ;;  %v2932_v26 = vadd.s32 %v5557_v54, %v5544_v40  ;;  %v2634_v46 = vadd.f32 %v5562_v45, %v5265_v35  ;;  %v2637_v34 = vadd.f32 %v5562_v45, %v5269_v60 }
 0x3b9   : > { %v2526_v27 = vpack.c.bf16 %v2510_v8, %v2508_v18  ;;  %v2525_v62 = vpack.c.bf16 %v2509_v23, %v2507_v24  ;;  %v2933_v16 = vadd.s32 %v5557_v54, %v5580_v7  ;;  %v2934_v60 = vadd.s32 %v5557_v54, %v5583_v57 }
 0x3ba   : > { %vm2948_vm8 = vcmp.lt.s32.totalorder %v2932_v26, 300  ;;  %v2642_v10 = vadd.f32 %v5263_v31, %v5562_v45  ;;  %v2645_v53 = vadd.f32 %v5267_v59, %v5562_v45  ;;  %v2935_v63 = vadd.s32 %v5557_v54, %v5595_v20 }
 0x3bb   : > { %3553 = vmatprep.mubr.msk.bf16.mxu0 %vm1603_vm2, %v2526_v27  ;;  %vm2947_vm2 = vcmp.lt.s32.totalorder %v2931_v1, 300  ;;  %vm2949_vm10 = vcmp.lt.s32.totalorder %v2933_v16, 300  ;;  %vm2950_vm11 = vcmp.lt.s32.totalorder %v2934_v60, 300  ;;  %v2936_v59 = vadd.s32 %v5557_v54, %v5598_v38 }
 0x3bc   : > { %2888 = vmatmul.mubr.bf16.gmra.mrb[108].mxu0 %v2525_v62  ;;  %vm3817_vm9 = vmpackc.low %vm2948_vm8, %vm2947_vm2  ;;  %v2650_v56 = vadd.f32 %v5562_v45, %v5273_v12  ;;  %v2653_v52 = vadd.f32 %v5562_v45, %v5277_v17  ;;  %vm2951_vm13 = vcmp.lt.s32.totalorder %v2935_v63, 300  ;;  %v5615_v12 = vadd.s32 56, %v5027_v13 }
 0x3bd   : > { %vm3823_vm12 = vmpackc.low %vm2950_vm11, %vm2949_vm10  ;;  %vm2952_vm14 = vcmp.lt.s32.totalorder %v2936_v59, 300  ;;  %v2937_v17 = vadd.s32 %v5557_v54, %v5612_v6  ;;  %v2658_v24 = vadd.f32 %v5271_v5, %v5562_v45  ;;  %v2661_v8 = vadd.f32 %v5275_v11, %v5562_v45  ;;  %v5844_v59 = vld [vmem:[#allocation14_spill] sm:$0xff] }
 0x3be   : > { %vm3829_vm15 = vmpackc.low %vm2952_vm14, %vm2951_vm13  ;;  %v2938_v19 = vadd.s32 %v5557_v54, %v5615_v12  ;;  %v5627_v62 = vadd.s32 64, %v5027_v13  ;;  %v5630_v1 = vadd.s32 72, %v5027_v13 }
 0x3bf   : > { %vm2953_vm0 = vcmp.lt.s32.totalorder %v2937_v17, 300  ;;  %v5845_v17 = vld [vmem:[#allocation17_spill] sm:$0xff] }
 0x3c0   : > { %vm2954_vm1 = vcmp.lt.s32.totalorder %v2938_v19, 300  ;;  %v2940_v11 = vadd.s32 %v5557_v54, %v5630_v1  ;;  %v2682_v19 = vadd.f32 %v5562_v45, %v5845_v17 }
 0x3c1   : > { %vm3835_vm3 = vmpackc.low %vm2954_vm1, %vm2953_vm0  ;;  %vm3018_vm0 = vcmp.eq.s32.totalorder %v5580_v7, %v5549_v28  ;;  %vm3019_vm1 = vcmp.eq.s32.totalorder %v5583_v57, %v5549_v28 }
 0x3c2   : > { %vm2956_vm5 = vcmp.lt.s32.totalorder %v2940_v11, 300 }
 0x457   : > { %v2833_v47 = vpop.f32.mrb[80].mxu0 }
 0x458   : > { %v2834_v32 = vadd.f32 %v5567_v48, %v2833_v47  ;;  %v2835_v41 = vpop.f32.mrb[81].mxu0 }
 0x459   : > { %v2836_v43 = vpop.f32.mrb[82].mxu0 }
 0x45a   : > { %v2896_v49 = vmul.f32 %v2834_v32, %v2634_v46  ;;  %v2837_v0 = vadd.f32 %v5567_v48, %v2836_v43  ;;  %v2838_v58 = vpop.f32.mrb[83].mxu0  ;;  %v2939_v32 = vadd.s32 %v5557_v54, %v5627_v62  ;;  %v2666_v43 = vadd.f32 %v5562_v45, %v5281_v50 }
 0x45b   : > { %v5842_v58 = vld [vmem:[#allocation15_spill] sm:$0xff]  ;;  %v5647_v50 = vadd.s32 88, %v5027_v13 }
 0x45c   : > { %v2897_v35 = vmul.f32 %v2837_v0, %v2637_v34  ;;  %vm2955_vm4 = vcmp.lt.s32.totalorder %v2939_v32, 300 }
 0x45d   : > { %vm3841_vm6 = vmpackc.low %vm2956_vm5, %vm2955_vm4  ;;  %vm3021_vm4 = vcmp.eq.s32.totalorder %v5598_v38, %v5549_v28  ;;  %vm3022_vm5 = vcmp.eq.s32.totalorder %v5612_v6, %v5549_v28 }
 0x45e   : > { %v3816_v14 = vpack.c.bf16 %v2897_v35, %v2896_v49  ;;  %v2669_v35 = vadd.f32 %v5562_v45, %v5842_v58 }
 0x45f   : > { %v2841_v3 = vpop.f32.mrb[84].mxu0 }
 0x460   : > { %v2842_v2 = vadd.f32 %v5567_v48, %v2841_v3  ;;  %v2843_v22 = vpop.f32.mrb[85].mxu0  ;;  %3818 = vmatprep.subr.msk.bf16.mxu1 %vm3817_vm9, %v3816_v14 }
 0x461   : > { %v2844_v55 = vpop.f32.mrb[86].mxu0  ;;  %3821 = vmatpush3.bf16.msk.msra.mxu1 %vm3817_vm9, %v3816_v14 }
 0x462   : > { %v2898_v44 = vmul.f32 %v2842_v2, %v2642_v10  ;;  %v2845_v61 = vadd.f32 %v5567_v48, %v2844_v55  ;;  %v2846_v33 = vpop.f32.mrb[87].mxu0  ;;  %v5644_v10 = vadd.s32 80, %v5027_v13  ;;  %v2942_v55 = vadd.s32 %v5557_v54, %v5647_v50 }
 0x464   : > { %v2899_v31 = vmul.f32 %v2845_v61, %v2645_v53  ;;  %v2941_v53 = vadd.s32 %v5557_v54, %v5644_v10  ;;  %v5843_v61 = vld [vmem:[#allocation13_spill] sm:$0xff]  ;;  %vm2958_vm8 = vcmp.lt.s32.totalorder %v2942_v55, 300 }
 0x465   : > { %v2674_v33 = vadd.f32 %v5843_v61, %v5562_v45 }
 0x466   : > { %v3822_v9 = vpack.c.bf16 %v2899_v31, %v2898_v44  ;;  %vm2957_vm2 = vcmp.lt.s32.totalorder %v2941_v53, 300 }
 0x467   : > { %v2849_v4 = vpop.f32.mrb[88].mxu0  ;;  %vm3847_vm9 = vmpackc.low %vm2958_vm8, %vm2957_vm2  ;;  %vm3025_vm2 = vcmp.eq.s32.totalorder %v5630_v1, %v5549_v28  ;;  %vm3026_vm8 = vcmp.eq.s32.totalorder %v5644_v10, %v5549_v28 }
 0x468   : > { %v2850_v37 = vadd.f32 %v5567_v48, %v2849_v4  ;;  %v2851_v39 = vpop.f32.mrb[89].mxu0  ;;  %3824 = vmatprep.subr.msk.bf16.mxu1 %vm3823_vm12, %v3822_v9 }
 0x469   : > { %v2852_v42 = vpop.f32.mrb[90].mxu0  ;;  %3827 = vmatpush3.bf16.msk.msra.mxu1 %vm3823_vm12, %v3822_v9  ;;  %v2677_v9 = vadd.f32 %v5844_v59, %v5562_v45 }
 0x46a   : > { %v2900_v21 = vmul.f32 %v2850_v37, %v2650_v56  ;;  %v2853_v30 = vadd.f32 %v5567_v48, %v2852_v42  ;;  %v2854_v51 = vpop.f32.mrb[91].mxu0  ;;  %v5659_v56 = vadd.s32 96, %v5027_v13  ;;  %v5662_v37 = vadd.s32 104, %v5027_v13 }
 0x46c   : > { %v2901_v15 = vmul.f32 %v2853_v30, %v2653_v52  ;;  %v2943_v30 = vadd.s32 %v5557_v54, %v5659_v56  ;;  %v2944_v51 = vadd.s32 %v5557_v54, %v5662_v37 }
 0x46e   : > { %v3828_v36 = vpack.c.bf16 %v2901_v15, %v2900_v21  ;;  %vm2959_vm10 = vcmp.lt.s32.totalorder %v2943_v30, 300  ;;  %vm2960_vm11 = vcmp.lt.s32.totalorder %v2944_v51, 300 }
 0x46f   : > { %v2857_v25 = vpop.f32.mrb[92].mxu0  ;;  %vm3853_vm12 = vmpackc.low %vm2960_vm11, %vm2959_vm10  ;;  %vm3028_vm10 = vcmp.eq.s32.totalorder %v5659_v56, %v5549_v28  ;;  %vm3029_vm11 = vcmp.eq.s32.totalorder %v5662_v37, %v5549_v28 }
 0x470   : > { %v2858_v18 = vadd.f32 %v5567_v48, %v2857_v25  ;;  %v2859_v23 = vpop.f32.mrb[93].mxu0  ;;  %3830 = vmatprep.subr.msk.bf16.mxu1 %vm3829_vm15, %v3828_v36 }
 0x471   : > { %v2860_v27 = vpop.f32.mrb[94].mxu0  ;;  %3833 = vmatpush3.bf16.msk.msra.mxu1 %vm3829_vm15, %v3828_v36 }
 0x472   : > { %v2902_v26 = vmul.f32 %v2858_v18, %v2658_v24  ;;  %v2861_v47 = vadd.f32 %v5567_v48, %v2860_v27  ;;  %v2862_v46 = vpop.f32.mrb[95].mxu0  ;;  %v5846_v18 = vld [vmem:[#allocation19_spill] sm:$0xff] }
 0x473   : > { %v2685_v23 = vadd.f32 %v5562_v45, %v5846_v18  ;;  %v2928_v46 = vadd.s32 112, %v5027_v13 }
 0x474   : > { %v2903_v5 = vmul.f32 %v2861_v47, %v2661_v8 }
 0x476   : > { %v3834_v41 = vpack.c.bf16 %v2903_v5, %v2902_v26  ;;  %v2929_v5 = vadd.s32 120, %v5027_v13 }
 0x477   : > { %v2865_v34 = vpop.f32.mrb[96].mxu0 }
 0x478   : > { %v2866_v49 = vadd.f32 %v5567_v48, %v2865_v34  ;;  %v2867_v0 = vpop.f32.mrb[97].mxu0  ;;  %3836 = vmatprep.subr.msk.bf16.mxu1 %vm3835_vm3, %v3834_v41  ;;  %v2946_v34 = vadd.s32 %v5557_v54, %v2929_v5 }
 0x479   : > { %v2868_v14 = vpop.f32.mrb[98].mxu0  ;;  %3839 = vmatpush3.bf16.msk.msra.mxu1 %vm3835_vm3, %v3834_v41  ;;  %v2945_v41 = vadd.s32 %v5557_v54, %v2928_v46  ;;  %vm3020_vm3 = vcmp.eq.s32.totalorder %v5595_v20, %v5549_v28 }
 0x47a   : > { %v2904_v16 = vmul.f32 %v2866_v49, %v2666_v43  ;;  %v2869_v60 = vadd.f32 %v5567_v48, %v2868_v14  ;;  %v2870_v3 = vpop.f32.mrb[99].mxu0  ;;  %v5847_v49 = vld [vmem:[#allocation16_spill] sm:$0xff]  ;;  %v5848_v14 = vld [vmem:[#allocation18_spill] sm:$0xff]  ;;  %vm2962_vm14 = vcmp.lt.s32.totalorder %v2946_v34, 300 }
 0x47b   : > { %v2690_v0 = vadd.f32 %v5847_v49, %v5562_v45  ;;  %vm2961_vm13 = vcmp.lt.s32.totalorder %v2945_v41, 300 }
 0x47c   : > { %v2905_v2 = vmul.f32 %v2869_v60, %v2669_v35  ;;  %vm3859_vm15 = vmpackc.low %vm2962_vm14, %vm2961_vm13  ;;  %vm3031_vm13 = vcmp.eq.s32.totalorder %v2929_v5, %v5549_v28 }
 0x47e   : > { %v3840_v22 = vpack.c.bf16 %v2905_v2, %v2904_v16  ;;  %v2693_v16 = vadd.f32 %v5848_v14, %v5562_v45 }
 0x47f   : > { %v2873_v44 = vpop.f32.mrb[100].mxu0 }
 0x480   : > { %v2874_v31 = vadd.f32 %v5567_v48, %v2873_v44  ;;  %v2875_v63 = vpop.f32.mrb[101].mxu0  ;;  %3842 = vmatprep.subr.msk.bf16.mxu1 %vm3841_vm6, %v3840_v22 }
 0x481   : > { %v2876_v4 = vpop.f32.mrb[102].mxu0  ;;  %3845 = vmatpush3.bf16.msk.msra.mxu1 %vm3841_vm6, %v3840_v22  ;;  %vm3024_vm6 = vcmp.eq.s32.totalorder %v5627_v62, %v5549_v28 }
 0x482   : > { %v2906_v39 = vmul.f32 %v2874_v31, %v2674_v33  ;;  %v2877_v52 = vadd.f32 %v5567_v48, %v2876_v4  ;;  %v2878_v42 = vpop.f32.mrb[103].mxu0 }
 0x484   : > { %v2907_v21 = vmul.f32 %v2877_v52, %v2677_v9 }
 0x486   : > { %v3846_v15 = vpack.c.bf16 %v2907_v21, %v2906_v39 }
 0x487   : > { %v2881_v36 = vpop.f32.mrb[104].mxu0 }
 0x488   : > { %v2882_v25 = vadd.f32 %v5567_v48, %v2881_v36  ;;  %v2883_v24 = vpop.f32.mrb[105].mxu0  ;;  %3848 = vmatprep.subr.msk.bf16.mxu1 %vm3847_vm9, %v3846_v15 }
 0x489   : > { %v2884_v8 = vpop.f32.mrb[106].mxu0  ;;  %3851 = vmatpush3.bf16.msk.msra.mxu1 %vm3847_vm9, %v3846_v15  ;;  %vm3027_vm9 = vcmp.eq.s32.totalorder %v5647_v50, %v5549_v28 }
 0x48a   : > { %v2908_v27 = vmul.f32 %v2882_v25, %v2682_v19  ;;  %v2885_v26 = vadd.f32 %v5567_v48, %v2884_v8  ;;  %v2886_v47 = vpop.f32.mrb[107].mxu0 }
 0x48c   : > { %v2909_v32 = vmul.f32 %v2885_v26, %v2685_v23 }
 0x48e   : > { %v3852_v11 = vpack.c.bf16 %v2909_v32, %v2908_v27 }
 0x48f   : > { %v2889_v43 = vpop.f32.mrb[108].mxu0 }
 0x490   : > { %v2890_v58 = vadd.f32 %v5567_v48, %v2889_v43  ;;  %v2891_v35 = vpop.f32.mrb[109].mxu0  ;;  %3854 = vmatprep.subr.msk.bf16.mxu1 %vm3853_vm12, %v3852_v11 }
 0x491   : > { %v2892_v60 = vpop.f32.mrb[110].mxu0  ;;  %3857 = vmatpush3.bf16.msk.msra.mxu1 %vm3853_vm12, %v3852_v11  ;;  %vm3030_vm12 = vcmp.eq.s32.totalorder %v2928_v46, %v5549_v28 }
 0x492   : > { %v2910_v13 = vmul.f32 %v2890_v58, %v2690_v0  ;;  %v2893_v3 = vadd.f32 %v5567_v48, %v2892_v60  ;;  %v2894_v2 = vpop.f32.mrb[111].mxu0 }
 0x494   : > { %v2911_v54 = vmul.f32 %v2893_v3, %v2693_v16 }
 0x496   : > { %v3858_v22 = vpack.c.bf16 %v2911_v54, %v2910_v13 }
 0x498   : > { %3860 = vmatprep.subr.msk.bf16.mxu1 %vm3859_vm15, %v3858_v22 }
 0x499   : > { %3863 = vmatpush3.bf16.msk.msra.mxu1 %vm3859_vm15, %v3858_v22 }
 0x49c   : > { %3762 = vmatmul.mubr.msk.f32.vlgmr.msra.gmra.mrb[48].mxu1 %vm3017_vm7, %v4413_v29  ;;  %vm3023_vm7 = vcmp.eq.s32.totalorder %v5615_v12, %v5549_v28 }
 0x49d   : > { %3764 = vmatprep.mubr.msk.f32.mxu1 %vm3018_vm0, %v4413_v29 }
 0x4a0   : > { %3765 = vmatmul.mubr.msk.f32.gmra.mrb[50].mxu1 %vm3019_vm1, %v4413_v29 }
 0x4a1   : > { %3767 = vmatprep.mubr.msk.f32.mxu1 %vm3020_vm3, %v4413_v29 }
 0x4a4   : > { %3768 = vmatmul.mubr.msk.f32.gmra.mrb[52].mxu1 %vm3021_vm4, %v4413_v29 }
 0x4a5   : > { %3770 = vmatprep.mubr.msk.f32.mxu1 %vm3022_vm5, %v4413_v29 }
 0x4a8   : > { %3771 = vmatmul.mubr.msk.f32.gmra.mrb[54].mxu1 %vm3023_vm7, %v4413_v29 }
 0x4a9   : > { %3773 = vmatprep.mubr.msk.f32.mxu1 %vm3024_vm6, %v4413_v29 }
 0x4ac   : > { %3774 = vmatmul.mubr.msk.f32.gmra.mrb[56].mxu1 %vm3025_vm2, %v4413_v29 }
 0x4ad   : > { %3776 = vmatprep.mubr.msk.f32.mxu1 %vm3026_vm8, %v4413_v29 }
 0x4b0   : > { %3777 = vmatmul.mubr.msk.f32.gmra.mrb[58].mxu1 %vm3027_vm9, %v4413_v29 }
 0x4b1   : > { %3779 = vmatprep.mubr.msk.f32.mxu1 %vm3028_vm10, %v4413_v29 }
 0x4b4   : > { %3780 = vmatmul.mubr.msk.f32.gmra.mrb[60].mxu1 %vm3029_vm11, %v4413_v29 }
 0x4b5   : > { %3782 = vmatprep.mubr.msk.f32.mxu1 %vm3030_vm12, %v4413_v29 }
 0x4b8   : > { %3783 = vmatmul.mubr.msk.f32.gmra.mrb[62].mxu1 %vm3031_vm13, %v4413_v29 }
 0x56f   : > { %v3763_v40 = vpop.f32.mrb[48].mxu1 }
 0x570   : > { %3210 = vst [vmem:[%s5730_s14 + $0x8] sm:$0xff] %v3763_v40  ;;  %v3130_v45 = vpop.f32.mrb[49].mxu1 }
 0x571   : > { %3209 = vst [vmem:[%s5730_s14] sm:$0xff] %v3130_v45 }
 0x573   : > { %v3766_v28 = vpop.f32.mrb[50].mxu1 }
 0x574   : > { %3212 = vst [vmem:[%s5730_s14 + $0x18] sm:$0xff] %v3766_v28  ;;  %v3140_v29 = vpop.f32.mrb[51].mxu1 }
 0x575   : > { %3211 = vst [vmem:[%s5730_s14 + $0x10] sm:$0xff] %v3140_v29 }
 0x577   : > { %v3769_v48 = vpop.f32.mrb[52].mxu1 }
 0x578   : > { %3214 = vst [vmem:[%s5730_s14 + $0x28] sm:$0xff] %v3769_v48  ;;  %v3150_v7 = vpop.f32.mrb[53].mxu1 }
 0x579   : > { %3213 = vst [vmem:[%s5730_s14 + $0x20] sm:$0xff] %v3150_v7 }
 0x57b   : > { %v3772_v57 = vpop.f32.mrb[54].mxu1 }
 0x57c   : > { %3216 = vst [vmem:[%s5730_s14 + $0x38] sm:$0xff] %v3772_v57  ;;  %v3160_v20 = vpop.f32.mrb[55].mxu1 }
 0x57d   : > { %3215 = vst [vmem:[%s5730_s14 + $0x30] sm:$0xff] %v3160_v20 }
 0x57f   : > { %v3775_v38 = vpop.f32.mrb[56].mxu1 }
 0x580   : > { %3218 = vst [vmem:[%s5730_s14 + $0x48] sm:$0xff] %v3775_v38  ;;  %v3170_v6 = vpop.f32.mrb[57].mxu1 }
 0x581   : > { %3217 = vst [vmem:[%s5730_s14 + $0x40] sm:$0xff] %v3170_v6 }
 0x583   : > { %v3778_v12 = vpop.f32.mrb[58].mxu1 }
 0x584   : > { %3220 = vst [vmem:[%s5730_s14 + $0x58] sm:$0xff] %v3778_v12  ;;  %v3180_v62 = vpop.f32.mrb[59].mxu1 }
 0x585   : > { %3219 = vst [vmem:[%s5730_s14 + $0x50] sm:$0xff] %v3180_v62 }
 0x587   : > { %v3781_v1 = vpop.f32.mrb[60].mxu1 }
 0x588   : > { %3222 = vst [vmem:[%s5730_s14 + $0x68] sm:$0xff] %v3781_v1  ;;  %v3190_v10 = vpop.f32.mrb[61].mxu1 }
 0x589   : > { %3221 = vst [vmem:[%s5730_s14 + $0x60] sm:$0xff] %v3190_v10 }
 0x58b   : > { %v3784_v50 = vpop.f32.mrb[62].mxu1 }
 0x58c   : > { %3224 = vst [vmem:[%s5730_s14 + $0x78] sm:$0xff] %v3784_v50  ;;  %v3200_v53 = vpop.f32.mrb[63].mxu1 }
 0x58d   : > { %3223 = vst [vmem:[%s5730_s14 + $0x70] sm:$0xff] %v3200_v53 }
 0x58e   : > { %4352 = shalt.err (!%p4349_p4)
}
 0x58f   : > { %s4353_s23 = scalar_lea.hbm %s5751_s13, 2048  ;;  %s4357_s21 = scalar_lea.hbm %s5849_s20, 6144 }
 0x590   : > { %p4354_p5 = scmp.ne.s32.totalorder %s5751_s13, %s4353_s23  ;;  %p4358_p8 = scmp.lt.u32.totalorder %s5751_s13, %s5849_s20 }
 0x591   : > { %p4359_p6 = scmp.lt.u32.totalorder %s4357_s21, %s4353_s23  ;;  %p4361_p13 = scmp.lt.u32.totalorder %s4353_s23, %s5751_s13 }
 0x592   : > { %p4355_p2 = pnand %p4354_p5, %p4531_p9 }
 0x593   : > { %p4360_p10 = por %p4359_p6, %p4358_p8 }
 0x594   : > { %p4356_p7 = pneg %p4355_p2 }
 0x595   : > { %p4362_p11 = por %p4361_p13, %p4360_p10 }
 0x597   : > { %p4363_p12 = pnand %p4362_p11, %p4356_p7 }
 0x599   : > { %4366 = shalt.err (!%p4363_p12)
}
 0x59a   : > { %s4415_s29 = smov 128   ;;  %s4416_s18 = smov 8  }
 0x59b   : > { %3929 = dma.vmem_to_hbm [thread:$0]  (%p4531_p9), %s5753_s17, 2048, %s5751_s13, %s3226_s25, %s4415_s29, %s4415_s29, %s4416_s18  }
 0x59c PF: > { %s5850_s30 = sld [smem:[#allocation8_spill]]  ;;  %s5851_s22 = sld [smem:[#allocation12_spill]] }
 0x59d   : > { %p3935_p0 = scmp.ge.s32.totalorder %s4405_s28, 2 }
 0x5a2   : > { %s3254_s15 = sand.u32 1, %s5850_s30   ;;  %p5852_p1 = scmp.ne.s32.totalorder %s5851_s22, 0 }
 0x5a3   : > { %s3255_s23 = scalar_lea.sflag [#allocation4], %s3254_s15 }
 0x5a4   : > { %p3932_p3 = pnand %p3935_p0, %p5852_p1 }
 0x5a6   : > { %4388 = dma.done.wait (!%p3932_p3), %s3255_s23, 2048  }
 0x5a7   : > { %4390 = vsyncadd (!%p3932_p3), %s3255_s23, 4294965248  ;;  %s5853_s28 = sld [smem:[#allocation10_spill]]  ;;  %s5854_s14 = sld [smem:[#allocation9_spill]] }
 0x5a8   : > { %s5855_s27 = sld [smem:[#allocation11_spill]]  ;;  %s5856_s25 = smov %s4397_s26 }
 0x5ad   : > { %p26_p4 = scmp.ge.s32.totalorder %s5853_s28, 5   ;;  %s5857_s26 = smov %s5854_s14 }
 0x5af   :  { %28 = sbr.rel (!%p26_p4) target bundleno = 7 (0x7), region = 123 }
 0x5b6   :  { %3260 = vsyncpa [#allocation3], 1 }
 0x5b7   :  { %3262 = vsyncpa [#allocation3 + $0x1], 1 }
 0x5b8   :  { %3263 = vsyncpa [#allocation4], 1 }
 0x5b9   :  { %3265 = vsyncpa [#allocation4 + $0x1], 1 }

</bundles_post_ra>
